<compile_context>
chip_gen: v5e
topology: v5e:2x2
jax: 0.10.0
libtpu: 0.0.40
codegen_flags: <defaults>
</compile_context>

<pallas_src>
import math
import functools

import jax
import jax.numpy as jnp
from jax import lax
from jax.experimental import pallas as pl
from jax.experimental.pallas import tpu as pltpu

TEMPERATURE = 0.6      # CrossAttentionBlock default
LN_EPS = 1e-5          # torch LayerNorm default
NEG_PAD = -1e30        # in-batch padded text keys
NEG_XBATCH = -2e30     # cross-batch keys (strictly worse than padded in-batch)


# ----------------------------------------------------------------------------
# Kernel
# ----------------------------------------------------------------------------
def _text_conditioner_kernel(
    x_ref,        # (BT, C)   f32   mel rows (batch folded into sublanes)
    g_ref,        # (Bp, G)   f32   global text embedding (rows >= B are zero pad)
    semb_ref,     # (BS, D)   f32   sequence text embedding
    mask_ref,     # (BT, BS)  f32   two-tier additive attention mask
    expand_ref,   # (BT, Bp)  bf16  one-hot row -> batch expand
    gather_ref,   # (Bp, BT)  bf16  (1/T) batch <- row mean-pool
    wfilm_ref,    # (G, 2C)   bf16  [gamma | beta] FiLM weights (fused)
    m2a_ref,      # (C, D)    bf16  mel -> attn projection
    wslab_ref,    # (D, 8D+C) bf16  [Wq* | Wk | Wv | Wo | FFN1 | attn->mel]
    ffn2_ref,     # (4D, D)   bf16
    bias_ref,     # (12, 4D)  f32   packed bias / LayerNorm gain rows
    scal_ref,     # (2,)      f32   SMEM: [film_scale, blend = sigmoid(tif)]
    out_ref,      # (BT, C)   f32
    *,
    num_heads, head_dim, C, D,
):
    f32, bf16 = jnp.float32, jnp.bfloat16
    Bp = expand_ref.shape[1]

    def dot(a, b):
        return jnp.dot(a, b, preferred_element_type=f32)

    x_orig = x_ref[...]                       # (BT, C) f32
    film_scale = scal_ref[0]
    blend = scal_ref[1]                       # sigmoid(text_impact_factor), precomputed

    # ---------------- FiLM on (Bp, G) rows; broadcast via one-hot matmul ------
    gb = dot(g_ref[...].astype(bf16), wfilm_ref[...]) + bias_ref[0:1, 0:2 * C]
    gb = 300.0 * jnp.tanh(gb * (1.0 / 300.0))                 # (Bp, 2C) f32
    gb_rows = dot(expand_ref[...], gb.astype(bf16))           # (BT, 2C) f32
    xf = film_scale * (gb_rows[:, 0:C] * x_orig + gb_rows[:, C:2 * C])

    # ---------------- mel -> cross-attention dim ------------------------------
    xa = dot(xf.astype(bf16), m2a_ref[...]) + bias_ref[1:2, 0:D]          # (BT, D)

    # ---------------- cross attention ------------------------------------------
    # 1/temperature and 1/sqrt(head_dim) are pre-folded into Wq / bq.
    q = dot(xa.astype(bf16), wslab_ref[:, 0:D]) + bias_ref[2:3, 0:D]      # (BT, D)
    kv = dot(semb_ref[...].astype(bf16), wslab_ref[:, D:3 * D]) \
        + bias_ref[3:4, 0:2 * D]                                          # (BS, 2D)
    qb, kvb = q.astype(bf16), kv.astype(bf16)
    mask = mask_ref[...]

    ctxs = []
    for h in range(num_heads):                 # static unroll (num_heads = D // 64)
        o = h * head_dim
        s = lax.dot_general(qb[:, o:o + head_dim], kvb[:, o:o + head_dim],
                            dimension_numbers=(((1,), (1,)), ((), ())),
                            preferred_element_type=f32)                   # (BT, BS)
        s = s + mask
        s = s - jnp.max(s, axis=-1, keepdims=True)
        probs = jnp.exp(s)
        # approx reciprocal lands on the EUP slot (documented ~1e-3 rel error)
        probs = probs * pl.reciprocal(jnp.sum(probs, axis=-1, keepdims=True),
                                      approx=True)
        ctxs.append(dot(probs.astype(bf16), kvb[:, D + o:D + o + head_dim]))
    ctx = jnp.concatenate(ctxs, axis=-1)                                   # (BT, D)
    attn_out = dot(ctx.astype(bf16), wslab_ref[:, 3 * D:4 * D]) + bias_ref[4:5, 0:D]

    def layernorm(v, gain, shift):
        mu = jnp.mean(v, axis=-1, keepdims=True)
        d = v - mu
        var = jnp.mean(d * d, axis=-1, keepdims=True)
        return d * lax.rsqrt(var + LN_EPS) * gain + shift

    x2 = layernorm(xa + attn_out, bias_ref[5:6, 0:D], bias_ref[6:7, 0:D])
    hmid = jnp.maximum(dot(x2.astype(bf16), wslab_ref[:, 4 * D:8 * D])
                       + bias_ref[7:8, 0:4 * D], 0.0)
    ffn = dot(hmid.astype(bf16), ffn2_ref[...]) + bias_ref[8:9, 0:D]
    x3 = layernorm(x2 + ffn, bias_ref[9:10, 0:D], bias_ref[10:11, 0:D])

    # ---------------- attn -> mel dim ------------------------------------------
    xm = dot(x3.astype(bf16), wslab_ref[:, 8 * D:8 * D + C]) + bias_ref[11:12, 0:C]

    # per-batch norm sqrt(mean_T sum_C xm^2) via one-hot gather / expand matmuls
    msq_b = dot(gather_ref[...], (xm * xm).astype(bf16))        # (Bp, C)
    nrm_b = jnp.sqrt(jnp.sum(msq_b, axis=-1, keepdims=True))    # (Bp, 1)
    inv_b = blend / jnp.maximum(nrm_b, 1e-5)                    # blend folded in
    inv_rows = dot(expand_ref[...],
                   jnp.broadcast_to(inv_b, (Bp, C)).astype(bf16))          # (BT, C)

    x_new = (1.0 - blend) * x_orig + inv_rows * xm

    # restore per-(B,T) channel norm of the original mel:
    #   ratio = sqrt(sum_old) * rsqrt(max(sum_new, eps^2))
    sum_new = jnp.sum(x_new * x_new, axis=-1, keepdims=True)
    sum_old = jnp.sum(x_orig * x_orig, axis=-1, keepdims=True)
    out_ref[...] = x_new * (jnp.sqrt(sum_old)
                            * lax.rsqrt(jnp.maximum(sum_new, 1e-16)))


# ----------------------------------------------------------------------------
# One-time parameter packing (hoisted out of the per-call path)
# ----------------------------------------------------------------------------
def prepare_params(p):
    f32, bf16 = jnp.float32, jnp.bfloat16
    G, C = p["fg_w"].shape
    D = p["wq"].shape[0]
    num_heads = D // 64
    head_dim = D // num_heads
    sm_scale = 1.0 / math.sqrt(head_dim)

    wq_s = p["wq"] * (sm_scale / TEMPERATURE)
    bq_s = p["bq"] * sm_scale

    w_film = jnp.concatenate([p["fg_w"], p["fb_w"]], axis=1).astype(bf16)   # (G, 2C)
    wkv = jnp.concatenate([p["wk"], p["wv"]], axis=1)                        # (D, 2D)
    wslab = jnp.concatenate(
        [wq_s, wkv, p["wo"], p["ffn1_w"], p["a2m_w"]], axis=1).astype(bf16)  # (D, 8D+C)
    m2a_w = p["m2a_w"].astype(bf16)                                          # (C, D)
    ffn2_w = p["ffn2_w"].astype(bf16)                                        # (4D, D)

    rows = [
        jnp.concatenate([p["fg_b"], p["fb_b"]], axis=1),   # 0: FiLM bias (1, 2C)
        p["m2a_b"],                                        # 1
        bq_s,                                              # 2
        jnp.concatenate([p["bk"], p["bv"]], axis=1),       # 3: (1, 2D)
        p["bo"],                                           # 4
        p["ln1_g"], p["ln1_b"],                            # 5, 6
        p["ffn1_b"],                                       # 7: (1, 4D)
        p["ffn2_b"],                                       # 8
        p["ln2_g"], p["ln2_b"],                            # 9, 10
        p["a2m_b"],                                        # 11: (1, C)
    ]
    W = max(r.shape[1] for r in rows)                      # = 4D
    bias = jnp.zeros((len(rows), W), f32)
    for i, r in enumerate(rows):
        bias = bias.at[i, : r.shape[1]].set(r[0].astype(f32))

    scal = jnp.stack([p["f_scale"][0, 0],
                      jax.nn.sigmoid(p["tif"][0, 0])]).astype(f32)          # SMEM pair

    return dict(w_film=w_film, m2a_w=m2a_w, wslab=wslab, ffn2_w=ffn2_w,
                bias=bias, scal=scal)


# ----------------------------------------------------------------------------
# Forward wrapper (jitted; only cheap activation-layout glue per call)
# ----------------------------------------------------------------------------
@jax.jit
def text_conditioner_forward(x_mel, global_emb, seq_emb, key_mask, prep):
    """x_mel: (B, C, T); global_emb: (B, G); seq_emb: (B, S, D);
    key_mask: (B, S) float, 1.0 where the text position is padding."""
    f32, bf16 = jnp.float32, jnp.bfloat16
    B, C, T = x_mel.shape
    S, D = seq_emb.shape[1], seq_emb.shape[2]
    G = global_emb.shape[1]
    H4 = prep["ffn2_w"].shape[0]
    num_heads = D // 64
    head_dim = D // num_heads
    BT, BS = B * T, B * S
    Bp = ((B + 7) // 8) * 8          # pad batch axis to a full sublane group

    x_rows = jnp.transpose(x_mel, (0, 2, 1)).reshape(BT, C).astype(f32)
    semb = seq_emb.reshape(BS, D).astype(f32)
    g_pad = jnp.zeros((Bp, G), f32).at[:B].set(global_emb.astype(f32))

    # block-diagonal helpers (compile-time constants under jit)
    row_b = jnp.repeat(jnp.arange(B), T)                                  # (BT,)
    col_b = jnp.repeat(jnp.arange(B), S)                                  # (BS,)
    same = row_b[:, None] == col_b[None, :]
    valid = key_mask.reshape(BS) < 0.5
    addmask = jnp.where(same, jnp.where(valid[None, :], 0.0, NEG_PAD),
                        NEG_XBATCH).astype(f32)                           # (BT, BS)
    expand = (row_b[:, None] == jnp.arange(Bp)[None, :]).astype(bf16)     # (BT, Bp)
    gather = ((jnp.arange(Bp)[:, None] == row_b[None, :]).astype(f32)
              / T).astype(bf16)                                           # (Bp, BT)

    operands = (x_rows, g_pad, semb, addmask, expand, gather,
                prep["w_film"], prep["m2a_w"], prep["wslab"], prep["ffn2_w"],
                prep["bias"], prep["scal"])

    flops = 2 * (Bp * G * 2 * C            # FiLM
                 + BT * Bp * 2 * C         # FiLM broadcast
                 + BT * C * D              # mel -> attn
                 + BT * D * D              # Q
                 + BS * D * 2 * D          # fused KV
                 + num_heads * 2 * BT * BS * head_dim   # scores + context
                 + BT * D * D              # Wo
                 + BT * D * H4 + BT * H4 * D            # FFN
                 + BT * D * C              # attn -> mel
                 + Bp * BT * C + BT * Bp * C)           # norm pooling
    transcendentals = num_heads * BT * BS + Bp * 2 * C + 4 * BT
    bytes_accessed = (sum(math.prod(a.shape) * a.dtype.itemsize for a in operands)
                      + BT * C * 4)

    vmem = pl.BlockSpec(memory_space=pltpu.MemorySpace.VMEM)
    smem = pl.BlockSpec(memory_space=pltpu.MemorySpace.SMEM)
    kernel = functools.partial(_text_conditioner_kernel,
                               num_heads=num_heads, head_dim=head_dim, C=C, D=D)

    # Single fused step (no grid): all operands are DMA'd exactly once.
    out_rows = pl.pallas_call(
        kernel,
        out_shape=jax.ShapeDtypeStruct((BT, C), f32),
        in_specs=[vmem] * 11 + [smem],
        out_specs=vmem,
        cost_estimate=pl.CostEstimate(flops=flops,
                                      transcendentals=transcendentals,
                                      bytes_accessed=bytes_accessed),
    )(*operands)

    return jnp.transpose(out_rows.reshape(B, T, C), (0, 2, 1))            # (B, C, T)


# ----------------------------------------------------------------------------
# Pure-JAX reference (f32) mirroring the PyTorch forward (tensor output only)
# ----------------------------------------------------------------------------
def reference_forward(x_mel, global_emb, seq_emb, key_mask, p):
    num_heads = seq_emb.shape[-1] // 64
    x_orig = jnp.transpose(x_mel, (0, 2, 1))                              # (B, T, C)
    gamma = global_emb @ p["fg_w"] + p["fg_b"]
    beta = global_emb @ p["fb_w"] + p["fb_b"]
    gamma = (300.0 * jnp.tanh(gamma / 300.0))[:, None, :]
    beta = (300.0 * jnp.tanh(beta / 300.0))[:, None, :]
    xf = p["f_scale"][0, 0] * (gamma * x_orig + beta)
    xa = xf @ p["m2a_w"] + p["m2a_b"]
    q = xa * (1.0 / TEMPERATURE)
    Q = q @ p["wq"] + p["bq"]
    K = seq_emb @ p["wk"] + p["bk"]
    V = seq_emb @ p["wv"] + p["bv"]
    B, T, D = Q.shape
    S = K.shape[1]
    hd = D // num_heads
    Qh = Q.reshape(B, T, num_heads, hd)
    Kh = K.reshape(B, S, num_heads, hd)
    Vh = V.reshape(B, S, num_heads, hd)
    s = jnp.einsum("bthd,bshd->bhts", Qh, Kh) / math.sqrt(hd)
    s = s + key_mask[:, None, None, :] * (-1e30)
    attn = jax.nn.softmax(s, axis=-1)
    ctx = jnp.einsum("bhts,bshd->bthd", attn, Vh).reshape(B, T, D)
    attn_out = ctx @ p["wo"] + p["bo"]

    def ln(v, g, b):
        mu = v.mean(-1, keepdims=True)
        var = ((v - mu) ** 2).mean(-1, keepdims=True)
        return (v - mu) / jnp.sqrt(var + LN_EPS) * g + b

    x2 = ln(xa + attn_out, p["ln1_g"], p["ln1_b"])
    ffn = jnp.maximum(x2 @ p["ffn1_w"] + p["ffn1_b"], 0.0) @ p["ffn2_w"] + p["ffn2_b"]
    x3 = ln(x2 + ffn, p["ln2_g"], p["ln2_b"])
    xm = x3 @ p["a2m_w"] + p["a2m_b"]                                      # (B, T, C)
    nrm = jnp.sqrt(jnp.mean(jnp.sum(xm**2, axis=-1), axis=-1))[:, None, None]
    x_cond = xm / jnp.maximum(nrm, 1e-5)
    blend = jax.nn.sigmoid(p["tif"][0, 0])
    x_new = (1.0 - blend) * x_orig + blend * x_cond
    new_norm = jnp.sqrt(jnp.sum(x_new**2, axis=-1, keepdims=True))
    old_norm = jnp.sqrt(jnp.sum(x_orig**2, axis=-1, keepdims=True))
    x_new = x_new * (old_norm / jnp.maximum(new_norm, 1e-8))
    return jnp.transpose(x_new, (0, 2, 1))


def make_params(key, C, D, G):
    """Deterministic synthetic parameters. All Linear weights are stored
    pre-transposed as (in, out) so the kernel computes x @ W."""
    ks = jax.random.split(key, 16)
    u = lambda k, shape, s=0.1: (jax.random.normal(k, shape, jnp.float32) * s)
    xav = lambda k, fi, fo: jax.random.uniform(
        k, (fi, fo), jnp.float32, -math.sqrt(6.0 / (fi + fo)), math.sqrt(6.0 / (fi + fo))
    )
    H = 4 * D
    return dict(
        fg_w=u(ks[0], (G, C)), fg_b=jnp.zeros((1, C), jnp.float32),
        fb_w=u(ks[1], (G, C)), fb_b=jnp.zeros((1, C), jnp.float32),
        f_scale=jnp.full((1, 1), 0.05, jnp.float32),
        m2a_w=xav(ks[2], C, D), m2a_b=jnp.zeros((1, D), jnp.float32),
        wq=u(ks[3], (D, D)), bq=u(ks[4], (1, D), 0.02),
        wk=u(ks[5], (D, D)), bk=u(ks[6], (1, D), 0.02),
        wv=u(ks[7], (D, D)), bv=u(ks[8], (1, D), 0.02),
        wo=u(ks[9], (D, D)), bo=jnp.zeros((1, D), jnp.float32),
        ln1_g=jnp.ones((1, D), jnp.float32), ln1_b=jnp.zeros((1, D), jnp.float32),
        ffn1_w=u(ks[10], (D, H)), ffn1_b=jnp.zeros((1, H), jnp.float32),
        ffn2_w=u(ks[11], (H, D)), ffn2_b=jnp.zeros((1, D), jnp.float32),
        ln2_g=jnp.ones((1, D), jnp.float32), ln2_b=jnp.zeros((1, D), jnp.float32),
        a2m_w=xav(ks[12], D, C), a2m_b=jnp.zeros((1, C), jnp.float32),
        tif=jnp.full((1, 1), 0.3, jnp.float32),
    )


if __name__ == "__main__":
    B, C, T = 2, 32, 16        # total_channels = 32, mel frames = 16
    D, G, S = 128, 48, 8       # cross_attention_dim=128 (2 heads), film_global_dim=48

    key = jax.random.PRNGKey(0)
    k_x, k_g, k_s, k_p = jax.random.split(key, 4)

    x_mel = jax.random.normal(k_x, (B, C, T), jnp.float32)
    global_emb = jax.random.normal(k_g, (B, G), jnp.float32)
    seq_emb = jax.random.normal(k_s, (B, S, D), jnp.float32)
    # key padding mask: 1.0 where the text token is padding
    valid_lens = jnp.array([S, 5])
    key_mask = (jnp.arange(S)[None, :] >= valid_lens[:, None]).astype(jnp.float32)

    params = make_params(k_p, C, D, G)
    prep = prepare_params(params)     # one-time packing, hoisted out of the call path

    out = text_conditioner_forward(x_mel, global_emb, seq_emb, key_mask, prep)
    out = jax.block_until_ready(out)

    with jax.default_matmul_precision("highest"):
        ref = jax.block_until_ready(
            reference_forward(x_mel, global_emb, seq_emb, key_mask, params)
        )

    assert out.shape == (B, C, T)
    err = float(jnp.max(jnp.abs(out - ref)))
    # tolerance relaxed vs the f32 reference because matmul operands are bf16
    assert bool(jnp.all(jnp.isfinite(out))) and err < 7e-2, f"max abs err {err}"
    print("KERNEL_OK")
</pallas_src>

<mosaic_0001>
module attributes {stable_mosaic.version = 11 : i64} {
  func.func @_text_conditioner_kernel(%arg0: memref<32x32xf32, #tpu.memory_space<vmem>>, %arg1: memref<8x48xf32, #tpu.memory_space<vmem>>, %arg2: memref<16x128xf32, #tpu.memory_space<vmem>>, %arg3: memref<32x16xf32, #tpu.memory_space<vmem>>, %arg4: memref<32x8xbf16, #tpu.memory_space<vmem>>, %arg5: memref<8x32xbf16, #tpu.memory_space<vmem>>, %arg6: memref<48x64xbf16, #tpu.memory_space<vmem>>, %arg7: memref<32x128xbf16, #tpu.memory_space<vmem>>, %arg8: memref<128x1056xbf16, #tpu.memory_space<vmem>>, %arg9: memref<512x128xbf16, #tpu.memory_space<vmem>>, %arg10: memref<12x512xf32, #tpu.memory_space<vmem>>, %arg11: memref<2xf32, #tpu.memory_space<smem>>, %arg12: memref<32x32xf32, #tpu.memory_space<vmem>>) attributes {dimension_semantics = [], scalar_prefetch = 0 : i64, scratch_operands = 0 : i64, tpu.core_type = #tpu.core_type<tc>} {
    %c0 = arith.constant 0 : index
    %c0_0 = arith.constant 0 : index
    %0 = vector.load %arg0[%c0, %c0_0] : memref<32x32xf32, #tpu.memory_space<vmem>>, vector<32x32xf32>
    %c0_1 = arith.constant 0 : index
    %1 = memref.load %arg11[%c0_1] : memref<2xf32, #tpu.memory_space<smem>>
    %c1 = arith.constant 1 : index
    %2 = memref.load %arg11[%c1] : memref<2xf32, #tpu.memory_space<smem>>
    %c0_2 = arith.constant 0 : index
    %c0_3 = arith.constant 0 : index
    %3 = vector.load %arg1[%c0_2, %c0_3] : memref<8x48xf32, #tpu.memory_space<vmem>>, vector<8x48xf32>
    %4 = arith.truncf %3 : vector<8x48xf32> to vector<8x48xbf16>
    %c0_4 = arith.constant 0 : index
    %c0_5 = arith.constant 0 : index
    %5 = vector.load %arg6[%c0_4, %c0_5] : memref<48x64xbf16, #tpu.memory_space<vmem>>, vector<48x64xbf16>
    %cst = arith.constant dense<0.000000e+00> : vector<8x64xf32>
    %6 = tpu.matmul %4, %5, %cst {dimension_numbers = #tpu.dot_dimension_numbers<[1], [0], [0], [1], [0, 0, 1, 1], [], []>} : vector<8x48xbf16>, vector<48x64xbf16>, vector<8x64xf32> -> vector<8x64xf32>
    %c0_6 = arith.constant 0 : index
    %c0_7 = arith.constant 0 : index
    %7 = vector.load %arg10[%c0_6, %c0_7] : memref<12x512xf32, #tpu.memory_space<vmem>>, vector<1x64xf32>
    %8 = vector.broadcast %7 : vector<1x64xf32> to vector<8x64xf32>
    %9 = arith.addf %6, %8 : vector<8x64xf32>
    %cst_8 = arith.constant 0.00333333341 : f32
    %10 = vector.broadcast %cst_8 : f32 to vector<8x64xf32>
    %11 = arith.mulf %9, %10 : vector<8x64xf32>
    %12 = math.tanh %11 : vector<8x64xf32>
    %cst_9 = arith.constant 3.000000e+02 : f32
    %13 = vector.broadcast %cst_9 : f32 to vector<8x64xf32>
    %14 = arith.mulf %13, %12 : vector<8x64xf32>
    %c0_10 = arith.constant 0 : index
    %c0_11 = arith.constant 0 : index
    %15 = vector.load %arg4[%c0_10, %c0_11] : memref<32x8xbf16, #tpu.memory_space<vmem>>, vector<32x8xbf16>
    %16 = arith.truncf %14 : vector<8x64xf32> to vector<8x64xbf16>
    %cst_12 = arith.constant dense<0.000000e+00> : vector<32x64xf32>
    %17 = tpu.matmul %15, %16, %cst_12 {dimension_numbers = #tpu.dot_dimension_numbers<[1], [0], [0], [1], [0, 0, 1, 1], [], []>} : vector<32x8xbf16>, vector<8x64xbf16>, vector<32x64xf32> -> vector<32x64xf32>
    %18 = vector.extract_strided_slice %17 {offsets = [0, 0], sizes = [32, 32], strides = [1, 1]} : vector<32x64xf32> to vector<32x32xf32>
    %19 = arith.mulf %18, %0 : vector<32x32xf32>
    %20 = vector.extract_strided_slice %17 {offsets = [0, 32], sizes = [32, 32], strides = [1, 1]} : vector<32x64xf32> to vector<32x32xf32>
    %21 = arith.addf %19, %20 : vector<32x32xf32>
    %22 = vector.broadcast %1 : f32 to vector<32x32xf32>
    %23 = arith.mulf %22, %21 : vector<32x32xf32>
    %24 = arith.truncf %23 : vector<32x32xf32> to vector<32x32xbf16>
    %c0_13 = arith.constant 0 : index
    %c0_14 = arith.constant 0 : index
    %25 = vector.load %arg7[%c0_13, %c0_14] : memref<32x128xbf16, #tpu.memory_space<vmem>>, vector<32x128xbf16>
    %cst_15 = arith.constant dense<0.000000e+00> : vector<32x128xf32>
    %26 = tpu.matmul %24, %25, %cst_15 {dimension_numbers = #tpu.dot_dimension_numbers<[1], [0], [0], [1], [0, 0, 1, 1], [], []>} : vector<32x32xbf16>, vector<32x128xbf16>, vector<32x128xf32> -> vector<32x128xf32>
    %c1_16 = arith.constant 1 : index
    %c0_17 = arith.constant 0 : index
    %27 = vector.load %arg10[%c1_16, %c0_17] : memref<12x512xf32, #tpu.memory_space<vmem>>, vector<1x128xf32>
    %28 = vector.broadcast %27 : vector<1x128xf32> to vector<32x128xf32>
    %29 = arith.addf %26, %28 : vector<32x128xf32>
    %30 = arith.truncf %29 : vector<32x128xf32> to vector<32x128xbf16>
    %c0_18 = arith.constant 0 : index
    %c0_19 = arith.constant 0 : index
    %31 = vector.load %arg8[%c0_18, %c0_19] : memref<128x1056xbf16, #tpu.memory_space<vmem>>, vector<128x128xbf16>
    %cst_20 = arith.constant dense<0.000000e+00> : vector<32x128xf32>
    %32 = tpu.matmul %30, %31, %cst_20 {dimension_numbers = #tpu.dot_dimension_numbers<[1], [0], [0], [1], [0, 0, 1, 1], [], []>} : vector<32x128xbf16>, vector<128x128xbf16>, vector<32x128xf32> -> vector<32x128xf32>
    %c2 = arith.constant 2 : index
    %c0_21 = arith.constant 0 : index
    %33 = vector.load %arg10[%c2, %c0_21] : memref<12x512xf32, #tpu.memory_space<vmem>>, vector<1x128xf32>
    %34 = vector.broadcast %33 : vector<1x128xf32> to vector<32x128xf32>
    %35 = arith.addf %32, %34 : vector<32x128xf32>
    %c0_22 = arith.constant 0 : index
    %c0_23 = arith.constant 0 : index
    %36 = vector.load %arg2[%c0_22, %c0_23] : memref<16x128xf32, #tpu.memory_space<vmem>>, vector<16x128xf32>
    %37 = arith.truncf %36 : vector<16x128xf32> to vector<16x128xbf16>
    %c0_24 = arith.constant 0 : index
    %c128 = arith.constant 128 : index
    %38 = vector.load %arg8[%c0_24, %c128] : memref<128x1056xbf16, #tpu.memory_space<vmem>>, vector<128x256xbf16>
    %cst_25 = arith.constant dense<0.000000e+00> : vector<16x256xf32>
    %39 = tpu.matmul %37, %38, %cst_25 {dimension_numbers = #tpu.dot_dimension_numbers<[1], [0], [0], [1], [0, 0, 1, 1], [], []>} : vector<16x128xbf16>, vector<128x256xbf16>, vector<16x256xf32> -> vector<16x256xf32>
    %c3 = arith.constant 3 : index
    %c0_26 = arith.constant 0 : index
    %40 = vector.load %arg10[%c3, %c0_26] : memref<12x512xf32, #tpu.memory_space<vmem>>, vector<1x256xf32>
    %41 = vector.broadcast %40 : vector<1x256xf32> to vector<16x256xf32>
    %42 = arith.addf %39, %41 : vector<16x256xf32>
    %43 = arith.truncf %35 : vector<32x128xf32> to vector<32x128xbf16>
    %44 = arith.truncf %42 : vector<16x256xf32> to vector<16x256xbf16>
    %c0_27 = arith.constant 0 : index
    %c0_28 = arith.constant 0 : index
    %45 = vector.load %arg3[%c0_27, %c0_28] : memref<32x16xf32, #tpu.memory_space<vmem>>, vector<32x16xf32>
    %46 = vector.extract_strided_slice %43 {offsets = [0, 0], sizes = [32, 64], strides = [1, 1]} : vector<32x128xbf16> to vector<32x64xbf16>
    %47 = vector.extract_strided_slice %44 {offsets = [0, 0], sizes = [16, 64], strides = [1, 1]} : vector<16x256xbf16> to vector<16x64xbf16>
    %cst_29 = arith.constant dense<0.000000e+00> : vector<32x16xf32>
    %48 = tpu.matmul %46, %47, %cst_29 {dimension_numbers = #tpu.dot_dimension_numbers<[1], [1], [0], [0], [0, 0, 1, 0], [], []>} : vector<32x64xbf16>, vector<16x64xbf16>, vector<32x16xf32> -> vector<32x16xf32>
    %49 = arith.addf %48, %45 : vector<32x16xf32>
    %cst_30 = arith.constant dense<0xFF800000> : vector<32xf32>
    %50 = vector.multi_reduction <maximumf>, %49, %cst_30 [1] : vector<32x16xf32> to vector<32xf32>
    %51 = vector.shape_cast %50 : vector<32xf32> to vector<32x1xf32>
    %52 = vector.broadcast %51 : vector<32x1xf32> to vector<32x16xf32>
    %53 = arith.subf %49, %52 : vector<32x16xf32>
    %54 = math.exp %53 : vector<32x16xf32>
    %cst_31 = arith.constant dense<0.000000e+00> : vector<32xf32>
    %55 = vector.multi_reduction <add>, %54, %cst_31 [1] : vector<32x16xf32> to vector<32xf32>
    %56 = vector.shape_cast %55 : vector<32xf32> to vector<32x1xf32>
    %57 = tpu.reciprocal %56 {approx = true} : vector<32x1xf32> -> vector<32x1xf32>
    %58 = vector.broadcast %57 : vector<32x1xf32> to vector<32x16xf32>
    %59 = arith.mulf %54, %58 : vector<32x16xf32>
    %60 = arith.truncf %59 : vector<32x16xf32> to vector<32x16xbf16>
    %61 = vector.extract_strided_slice %44 {offsets = [0, 128], sizes = [16, 64], strides = [1, 1]} : vector<16x256xbf16> to vector<16x64xbf16>
    %cst_32 = arith.constant dense<0.000000e+00> : vector<32x64xf32>
    %62 = tpu.matmul %60, %61, %cst_32 {dimension_numbers = #tpu.dot_dimension_numbers<[1], [0], [0], [1], [0, 0, 1, 1], [], []>} : vector<32x16xbf16>, vector<16x64xbf16>, vector<32x64xf32> -> vector<32x64xf32>
    %63 = vector.extract_strided_slice %43 {offsets = [0, 64], sizes = [32, 64], strides = [1, 1]} : vector<32x128xbf16> to vector<32x64xbf16>
    %64 = vector.extract_strided_slice %44 {offsets = [0, 64], sizes = [16, 64], strides = [1, 1]} : vector<16x256xbf16> to vector<16x64xbf16>
    %cst_33 = arith.constant dense<0.000000e+00> : vector<32x16xf32>
    %65 = tpu.matmul %63, %64, %cst_33 {dimension_numbers = #tpu.dot_dimension_numbers<[1], [1], [0], [0], [0, 0, 1, 0], [], []>} : vector<32x64xbf16>, vector<16x64xbf16>, vector<32x16xf32> -> vector<32x16xf32>
    %66 = arith.addf %65, %45 : vector<32x16xf32>
    %cst_34 = arith.constant dense<0xFF800000> : vector<32xf32>
    %67 = vector.multi_reduction <maximumf>, %66, %cst_34 [1] : vector<32x16xf32> to vector<32xf32>
    %68 = vector.shape_cast %67 : vector<32xf32> to vector<32x1xf32>
    %69 = vector.broadcast %68 : vector<32x1xf32> to vector<32x16xf32>
    %70 = arith.subf %66, %69 : vector<32x16xf32>
    %71 = math.exp %70 : vector<32x16xf32>
    %cst_35 = arith.constant dense<0.000000e+00> : vector<32xf32>
    %72 = vector.multi_reduction <add>, %71, %cst_35 [1] : vector<32x16xf32> to vector<32xf32>
    %73 = vector.shape_cast %72 : vector<32xf32> to vector<32x1xf32>
    %74 = tpu.reciprocal %73 {approx = true} : vector<32x1xf32> -> vector<32x1xf32>
    %75 = vector.broadcast %74 : vector<32x1xf32> to vector<32x16xf32>
    %76 = arith.mulf %71, %75 : vector<32x16xf32>
    %77 = arith.truncf %76 : vector<32x16xf32> to vector<32x16xbf16>
    %78 = vector.extract_strided_slice %44 {offsets = [0, 192], sizes = [16, 64], strides = [1, 1]} : vector<16x256xbf16> to vector<16x64xbf16>
    %cst_36 = arith.constant dense<0.000000e+00> : vector<32x64xf32>
    %79 = tpu.matmul %77, %78, %cst_36 {dimension_numbers = #tpu.dot_dimension_numbers<[1], [0], [0], [1], [0, 0, 1, 1], [], []>} : vector<32x16xbf16>, vector<16x64xbf16>, vector<32x64xf32> -> vector<32x64xf32>
    %80 = tpu.concatenate %62, %79 in 1 : vector<32x64xf32>, vector<32x64xf32> -> vector<32x128xf32>
    %81 = arith.truncf %80 : vector<32x128xf32> to vector<32x128xbf16>
    %c0_37 = arith.constant 0 : index
    %c384 = arith.constant 384 : index
    %82 = vector.load %arg8[%c0_37, %c384] : memref<128x1056xbf16, #tpu.memory_space<vmem>>, vector<128x128xbf16>
    %cst_38 = arith.constant dense<0.000000e+00> : vector<32x128xf32>
    %83 = tpu.matmul %81, %82, %cst_38 {dimension_numbers = #tpu.dot_dimension_numbers<[1], [0], [0], [1], [0, 0, 1, 1], [], []>} : vector<32x128xbf16>, vector<128x128xbf16>, vector<32x128xf32> -> vector<32x128xf32>
    %c4 = arith.constant 4 : index
    %c0_39 = arith.constant 0 : index
    %84 = vector.load %arg10[%c4, %c0_39] : memref<12x512xf32, #tpu.memory_space<vmem>>, vector<1x128xf32>
    %85 = vector.broadcast %84 : vector<1x128xf32> to vector<32x128xf32>
    %86 = arith.addf %83, %85 : vector<32x128xf32>
    %87 = arith.addf %29, %86 : vector<32x128xf32>
    %c5 = arith.constant 5 : index
    %c0_40 = arith.constant 0 : index
    %88 = vector.load %arg10[%c5, %c0_40] : memref<12x512xf32, #tpu.memory_space<vmem>>, vector<1x128xf32>
    %c6 = arith.constant 6 : index
    %c0_41 = arith.constant 0 : index
    %89 = vector.load %arg10[%c6, %c0_41] : memref<12x512xf32, #tpu.memory_space<vmem>>, vector<1x128xf32>
    %cst_42 = arith.constant dense<0.000000e+00> : vector<32xf32>
    %90 = vector.multi_reduction <add>, %87, %cst_42 [1] : vector<32x128xf32> to vector<32xf32>
    %91 = vector.shape_cast %90 : vector<32xf32> to vector<32x1xf32>
    %cst_43 = arith.constant 1.280000e+02 : f32
    %92 = vector.broadcast %cst_43 : f32 to vector<32x1xf32>
    %93 = arith.divf %91, %92 : vector<32x1xf32>
    %94 = vector.broadcast %93 : vector<32x1xf32> to vector<32x128xf32>
    %95 = arith.subf %87, %94 : vector<32x128xf32>
    %96 = arith.mulf %95, %95 : vector<32x128xf32>
    %cst_44 = arith.constant dense<0.000000e+00> : vector<32xf32>
    %97 = vector.multi_reduction <add>, %96, %cst_44 [1] : vector<32x128xf32> to vector<32xf32>
    %98 = vector.shape_cast %97 : vector<32xf32> to vector<32x1xf32>
    %cst_45 = arith.constant 1.280000e+02 : f32
    %99 = vector.broadcast %cst_45 : f32 to vector<32x1xf32>
    %100 = arith.divf %98, %99 : vector<32x1xf32>
    %cst_46 = arith.constant 9.99999974E-6 : f32
    %101 = vector.broadcast %cst_46 : f32 to vector<32x1xf32>
    %102 = arith.addf %100, %101 : vector<32x1xf32>
    %103 = math.rsqrt %102 : vector<32x1xf32>
    %104 = vector.broadcast %103 : vector<32x1xf32> to vector<32x128xf32>
    %105 = arith.mulf %95, %104 : vector<32x128xf32>
    %106 = vector.broadcast %88 : vector<1x128xf32> to vector<32x128xf32>
    %107 = arith.mulf %105, %106 : vector<32x128xf32>
    %108 = vector.broadcast %89 : vector<1x128xf32> to vector<32x128xf32>
    %109 = arith.addf %107, %108 : vector<32x128xf32>
    %110 = arith.truncf %109 : vector<32x128xf32> to vector<32x128xbf16>
    %c0_47 = arith.constant 0 : index
    %c512 = arith.constant 512 : index
    %111 = vector.load %arg8[%c0_47, %c512] : memref<128x1056xbf16, #tpu.memory_space<vmem>>, vector<128x512xbf16>
    %cst_48 = arith.constant dense<0.000000e+00> : vector<32x512xf32>
    %112 = tpu.matmul %110, %111, %cst_48 {dimension_numbers = #tpu.dot_dimension_numbers<[1], [0], [0], [1], [0, 0, 1, 1], [], []>} : vector<32x128xbf16>, vector<128x512xbf16>, vector<32x512xf32> -> vector<32x512xf32>
    %c7 = arith.constant 7 : index
    %c0_49 = arith.constant 0 : index
    %113 = vector.load %arg10[%c7, %c0_49] : memref<12x512xf32, #tpu.memory_space<vmem>>, vector<1x512xf32>
    %114 = vector.broadcast %113 : vector<1x512xf32> to vector<32x512xf32>
    %115 = arith.addf %112, %114 : vector<32x512xf32>
    %cst_50 = arith.constant 0.000000e+00 : f32
    %116 = vector.broadcast %cst_50 : f32 to vector<32x512xf32>
    %117 = arith.maximumf %115, %116 : vector<32x512xf32>
    %118 = arith.truncf %117 : vector<32x512xf32> to vector<32x512xbf16>
    %c0_51 = arith.constant 0 : index
    %c0_52 = arith.constant 0 : index
    %119 = vector.load %arg9[%c0_51, %c0_52] : memref<512x128xbf16, #tpu.memory_space<vmem>>, vector<512x128xbf16>
    %cst_53 = arith.constant dense<0.000000e+00> : vector<32x128xf32>
    %120 = tpu.matmul %118, %119, %cst_53 {dimension_numbers = #tpu.dot_dimension_numbers<[1], [0], [0], [1], [0, 0, 1, 1], [], []>} : vector<32x512xbf16>, vector<512x128xbf16>, vector<32x128xf32> -> vector<32x128xf32>
    %c8 = arith.constant 8 : index
    %c0_54 = arith.constant 0 : index
    %121 = vector.load %arg10[%c8, %c0_54] : memref<12x512xf32, #tpu.memory_space<vmem>>, vector<1x128xf32>
    %122 = vector.broadcast %121 : vector<1x128xf32> to vector<32x128xf32>
    %123 = arith.addf %120, %122 : vector<32x128xf32>
    %124 = arith.addf %109, %123 : vector<32x128xf32>
    %c9 = arith.constant 9 : index
    %c0_55 = arith.constant 0 : index
    %125 = vector.load %arg10[%c9, %c0_55] : memref<12x512xf32, #tpu.memory_space<vmem>>, vector<1x128xf32>
    %c10 = arith.constant 10 : index
    %c0_56 = arith.constant 0 : index
    %126 = vector.load %arg10[%c10, %c0_56] : memref<12x512xf32, #tpu.memory_space<vmem>>, vector<1x128xf32>
    %cst_57 = arith.constant dense<0.000000e+00> : vector<32xf32>
    %127 = vector.multi_reduction <add>, %124, %cst_57 [1] : vector<32x128xf32> to vector<32xf32>
    %128 = vector.shape_cast %127 : vector<32xf32> to vector<32x1xf32>
    %cst_58 = arith.constant 1.280000e+02 : f32
    %129 = vector.broadcast %cst_58 : f32 to vector<32x1xf32>
    %130 = arith.divf %128, %129 : vector<32x1xf32>
    %131 = vector.broadcast %130 : vector<32x1xf32> to vector<32x128xf32>
    %132 = arith.subf %124, %131 : vector<32x128xf32>
    %133 = arith.mulf %132, %132 : vector<32x128xf32>
    %cst_59 = arith.constant dense<0.000000e+00> : vector<32xf32>
    %134 = vector.multi_reduction <add>, %133, %cst_59 [1] : vector<32x128xf32> to vector<32xf32>
    %135 = vector.shape_cast %134 : vector<32xf32> to vector<32x1xf32>
    %cst_60 = arith.constant 1.280000e+02 : f32
    %136 = vector.broadcast %cst_60 : f32 to vector<32x1xf32>
    %137 = arith.divf %135, %136 : vector<32x1xf32>
    %cst_61 = arith.constant 9.99999974E-6 : f32
    %138 = vector.broadcast %cst_61 : f32 to vector<32x1xf32>
    %139 = arith.addf %137, %138 : vector<32x1xf32>
    %140 = math.rsqrt %139 : vector<32x1xf32>
    %141 = vector.broadcast %140 : vector<32x1xf32> to vector<32x128xf32>
    %142 = arith.mulf %132, %141 : vector<32x128xf32>
    %143 = vector.broadcast %125 : vector<1x128xf32> to vector<32x128xf32>
    %144 = arith.mulf %142, %143 : vector<32x128xf32>
    %145 = vector.broadcast %126 : vector<1x128xf32> to vector<32x128xf32>
    %146 = arith.addf %144, %145 : vector<32x128xf32>
    %147 = arith.truncf %146 : vector<32x128xf32> to vector<32x128xbf16>
    %c0_62 = arith.constant 0 : index
    %c1024 = arith.constant 1024 : index
    %148 = vector.load %arg8[%c0_62, %c1024] : memref<128x1056xbf16, #tpu.memory_space<vmem>>, vector<128x32xbf16>
    %cst_63 = arith.constant dense<0.000000e+00> : vector<32x32xf32>
    %149 = tpu.matmul %147, %148, %cst_63 {dimension_numbers = #tpu.dot_dimension_numbers<[1], [0], [0], [1], [0, 0, 1, 1], [], []>} : vector<32x128xbf16>, vector<128x32xbf16>, vector<32x32xf32> -> vector<32x32xf32>
    %c11 = arith.constant 11 : index
    %c0_64 = arith.constant 0 : index
    %150 = vector.load %arg10[%c11, %c0_64] : memref<12x512xf32, #tpu.memory_space<vmem>>, vector<1x32xf32>
    %151 = vector.broadcast %150 : vector<1x32xf32> to vector<32x32xf32>
    %152 = arith.addf %149, %151 : vector<32x32xf32>
    %c0_65 = arith.constant 0 : index
    %c0_66 = arith.constant 0 : index
    %153 = vector.load %arg5[%c0_65, %c0_66] : memref<8x32xbf16, #tpu.memory_space<vmem>>, vector<8x32xbf16>
    %154 = arith.mulf %152, %152 : vector<32x32xf32>
    %155 = arith.truncf %154 : vector<32x32xf32> to vector<32x32xbf16>
    %cst_67 = arith.constant dense<0.000000e+00> : vector<8x32xf32>
    %156 = tpu.matmul %153, %155, %cst_67 {dimension_numbers = #tpu.dot_dimension_numbers<[1], [0], [0], [1], [0, 0, 1, 1], [], []>} : vector<8x32xbf16>, vector<32x32xbf16>, vector<8x32xf32> -> vector<8x32xf32>
    %cst_68 = arith.constant dense<0.000000e+00> : vector<8xf32>
    %157 = vector.multi_reduction <add>, %156, %cst_68 [1] : vector<8x32xf32> to vector<8xf32>
    %158 = vector.shape_cast %157 : vector<8xf32> to vector<8x1xf32>
    %159 = math.sqrt %158 : vector<8x1xf32>
    %cst_69 = arith.constant 9.99999974E-6 : f32
    %160 = vector.broadcast %cst_69 : f32 to vector<8x1xf32>
    %161 = arith.maximumf %159, %160 : vector<8x1xf32>
    %162 = vector.broadcast %2 : f32 to vector<8x1xf32>
    %163 = arith.divf %162, %161 : vector<8x1xf32>
    %c0_70 = arith.constant 0 : index
    %c0_71 = arith.constant 0 : index
    %164 = vector.load %arg4[%c0_70, %c0_71] : memref<32x8xbf16, #tpu.memory_space<vmem>>, vector<32x8xbf16>
    %165 = vector.shape_cast %163 : vector<8x1xf32> to vector<8x1xf32>
    %166 = vector.broadcast %165 : vector<8x1xf32> to vector<8x32xf32>
    %167 = arith.truncf %166 : vector<8x32xf32> to vector<8x32xbf16>
    %cst_72 = arith.constant dense<0.000000e+00> : vector<32x32xf32>
    %168 = tpu.matmul %164, %167, %cst_72 {dimension_numbers = #tpu.dot_dimension_numbers<[1], [0], [0], [1], [0, 0, 1, 1], [], []>} : vector<32x8xbf16>, vector<8x32xbf16>, vector<32x32xf32> -> vector<32x32xf32>
    %cst_73 = arith.constant 1.000000e+00 : f32
    %169 = arith.subf %cst_73, %2 : f32
    %170 = vector.broadcast %169 : f32 to vector<32x32xf32>
    %171 = arith.mulf %170, %0 : vector<32x32xf32>
    %172 = arith.mulf %168, %152 : vector<32x32xf32>
    %173 = arith.addf %171, %172 : vector<32x32xf32>
    %174 = arith.mulf %173, %173 : vector<32x32xf32>
    %cst_74 = arith.constant dense<0.000000e+00> : vector<32xf32>
    %175 = vector.multi_reduction <add>, %174, %cst_74 [1] : vector<32x32xf32> to vector<32xf32>
    %176 = vector.shape_cast %175 : vector<32xf32> to vector<32x1xf32>
    %177 = arith.mulf %0, %0 : vector<32x32xf32>
    %cst_75 = arith.constant dense<0.000000e+00> : vector<32xf32>
    %178 = vector.multi_reduction <add>, %177, %cst_75 [1] : vector<32x32xf32> to vector<32xf32>
    %179 = vector.shape_cast %178 : vector<32xf32> to vector<32x1xf32>
    %180 = math.sqrt %179 : vector<32x1xf32>
    %cst_76 = arith.constant 1.000000e-16 : f32
    %181 = vector.broadcast %cst_76 : f32 to vector<32x1xf32>
    %182 = arith.maximumf %176, %181 : vector<32x1xf32>
    %183 = math.rsqrt %182 : vector<32x1xf32>
    %184 = arith.mulf %180, %183 : vector<32x1xf32>
    %185 = vector.broadcast %184 : vector<32x1xf32> to vector<32x32xf32>
    %186 = arith.mulf %173, %185 : vector<32x32xf32>
    %c0_77 = arith.constant 0 : index
    %c0_78 = arith.constant 0 : index
    %187 = vector.load %arg12[%c0_77, %c0_78] : memref<32x32xf32, #tpu.memory_space<vmem>>, vector<32x32xf32>
    tpu.vector_store %arg12[%c0_77, %c0_78], %186 {strides = array<i32>} : memref<32x32xf32, #tpu.memory_space<vmem>>, vector<32x32xf32>,
    return
  }
}

</mosaic_0001>

<bundles_post_ra>
// kernel: eq.25
= control target key start
LH: loop header
LB: loop body
LE: loop exit
PB: predicated region body
PF: predicated region fallthrough
CT: control target
= control target key end

     0   :  { %vm7_vm0 = vcmask 64512   ;;  %vm13_vm1 = vcmask 130112   ;;  %s39_s0 = inlined_call_operand.vmem [shape: s32[2,8], index: 0, kind: input, shape index: {}]   ;;  %s40_s1 = inlined_call_operand.vmem [shape: s32[16], index: 1, kind: output, shape index: {}]  }
   0x1   :  { %v4_v0 = vld [vmem:[%s39_s0] sm:$0x3]  ;;  %s22_s0 = smov 8  }
   0x2   :  { %5 = vst [vmem:[#allocation1] sm:$0x3] %v4_v0 }
   0x9   :  { %v10_v1 = vld [vmem:[#allocation1 + $0x1] sm:$0x1]   ;;  %v6_v2 = vld [vmem:[#allocation1] sm:$0x1]  }
   0xa   :  { %11 = vrot.lane.b32.xlu0 %v10_v1, %s22_s0  ;;  %8 = vst.msk [vmem:[#allocation0] sm:$0x1] %vm7_vm0, %v6_v2  }
  0x7c   :  { %v12_v3 = vpop.permute.xlu0 %11  }
  0x7d   :  { %14 = vst.msk [vmem:[#allocation0] sm:$0x1] %vm13_vm1, %v12_v3  }
  0x84   :  { %v17_v4 = vld [vmem:[#allocation0] sm:$0x1] }
  0x85   :  { %20 = vst [vmem:[%s40_s1] sm:$0x1] %v17_v4 }

// kernel: eq.22
= control target key start
LH: loop header
LB: loop body
LE: loop exit
PB: predicated region body
PF: predicated region fallthrough
CT: control target
= control target key end

     0   :  { %vm7_vm0 = vcmask 130048   ;;  %vm13_vm1 = vcmask 261248   ;;  %s39_s0 = inlined_call_operand.vmem [shape: s32[2,16], index: 0, kind: input, shape index: {}]   ;;  %s40_s1 = inlined_call_operand.vmem [shape: s32[32], index: 1, kind: output, shape index: {}]  }
   0x1   :  { %v4_v0 = vld [vmem:[%s39_s0] sm:$0x3]  ;;  %s22_s0 = smov 16  }
   0x2   :  { %5 = vst [vmem:[#allocation1] sm:$0x3] %v4_v0 }
   0x9   :  { %v10_v1 = vld [vmem:[#allocation1 + $0x1] sm:$0x1]   ;;  %v6_v2 = vld [vmem:[#allocation1] sm:$0x1]  }
   0xa   :  { %11 = vrot.lane.b32.xlu0 %v10_v1, %s22_s0  ;;  %8 = vst.msk [vmem:[#allocation0] sm:$0x1] %vm7_vm0, %v6_v2  }
  0x7c   :  { %v12_v3 = vpop.permute.xlu0 %11  }
  0x7d   :  { %14 = vst.msk [vmem:[#allocation0] sm:$0x1] %vm13_vm1, %v12_v3  }
  0x84   :  { %v17_v4 = vld [vmem:[#allocation0] sm:$0x1] }
  0x85   :  { %20 = vst [vmem:[%s40_s1] sm:$0x1] %v17_v4 }

// kernel: text_conditioner_forward.1
= control target key start
LH: loop header
LB: loop body
LE: loop exit
PB: predicated region body
PF: predicated region fallthrough
CT: control target
= control target key end

     0   :  { %17 = vsyncpa [#allocation4], 0  ;;  %s3637_s0 = inlined_call_operand.vmem [shape: f32[32,32], index: 0, kind: input, shape index: {}]   ;;  %s3638_s1 = inlined_call_operand.vmem [shape: f32[8,48], index: 1, kind: input, shape index: {}]   ;;  %s3639_s2 = inlined_call_operand.vmem [shape: f32[16,128], index: 2, kind: input, shape index: {}]   ;;  %s3640_s3 = inlined_call_operand.vmem [shape: f32[32,16], index: 3, kind: input, shape index: {}]   ;;  %s3641_s4 = inlined_call_operand.vmem [shape: bf16[32,8], index: 4, kind: input, shape index: {}]   ;;  %s3642_s5 = inlined_call_operand.vmem [shape: bf16[8,32], index: 5, kind: input, shape index: {}]   ;;  %s3643_s6 = inlined_call_operand.vmem [shape: bf16[48,64], index: 6, kind: input, shape index: {}]   ;;  %s3644_s7 = inlined_call_operand.vmem [shape: bf16[32,128], index: 7, kind: input, shape index: {}]   ;;  %s3645_s8 = inlined_call_operand.vmem [shape: bf16[128,1056], index: 8, kind: input, shape index: {}]   ;;  %s3646_s9 = inlined_call_operand.vmem [shape: bf16[512,128], index: 9, kind: input, shape index: {}]   ;;  %s3647_s10 = inlined_call_operand.vmem [shape: f32[12,512], index: 10, kind: input, shape index: {}]   ;;  %s3648_s11 = inlined_call_operand.vmem [shape: f32[2], index: 11, kind: input, shape index: {}]   ;;  %s3649_s12 = inlined_call_operand.hbm [shape: f32[32,32], index: 12, kind: output, shape index: {}]  }
   0x1   :  { %18 = vsyncpa [#allocation3], 0  ;;  %s46_s23 = sshll.u32 %s3648_s11, 4  ;;  %s2667_s24 = smov [#allocation2]   ;;  %s47_s23 = int_to_ptr.vmem [resolvable:$true] %s46_s23 }
   0x2   :  { %49 = dma.vmem_to_smem %s47_s23, 16, %s2667_s24, [#allocation4]  }
   0x3   :  { %2663 = dma.done.wait [#allocation4], 16  }
   0x4   :  { %2664 = vsyncadd [#allocation4], 4294967280 }
   0x5   :  { %54 = sfence }
   0x6   :  { %v2423_v0 = vld [vmem:[%s3643_s6 + $0x10] sm:$0xff]  ;;  %v2422_v1 = vld [vmem:[%s3643_s6 + $0x8] sm:$0xff]  ;;  %v2421_v2 = vld [vmem:[%s3643_s6] sm:$0xff]  ;;  %vm89_vm0 = vcmask 392192   ;;  %vm131_vm1 = vcmask 1043456   ;;  %vm124_vm2 = vcmask 64512  }
   0x7   :  { %98 = vmatpush.bf16.msra.mxu3 %v2423_v0  ;;  %v62_v3 = vld [vmem:[%s3638_s1] sm:$0xff]  ;;  %v2425_v15 = vld [vmem:[%s3641_s4 + $0x8] sm:$0xff]  ;;  %s2668_s18 = smov 96   ;;  %s2778_s23 = sld [smem:[#allocation2]]  ;;  %v2448_v24 = vld [vmem:[%s3645_s8 + $0x1b8] sm:$0xf] }
   0x8   :  { %v63_v4 = vpack.c.bf16 %v62_v3, %v62_v3  ;;  %v70_v5 = vld [vmem:[%s3647_s10] ss:$0 sm:$0xff]  ;;  %v2427_v20 = vld [vmem:[%s3644_s7 + $0x8] sm:$0xff]  ;;  %v2085_v23 = vld [vmem:[%s3645_s8 + $0x220] sm:$0xf0]  ;;  %vm202_vm3 = vcmask 261120  }
   0x9   :  { %v2424_v14 = vld [vmem:[%s3641_s4] sm:$0xff]  ;;  %215 = vmatpush.bf16.msra.mxu2 %v2427_v20  ;;  %v2077_v27 = vld [vmem:[%s3645_s8 + $0x1d8] sm:$0xf0]  ;;  %v2075_v31 = vld [vmem:[%s3645_s8 + $0x1b4] sm:$0xf]  ;;  %vm473_vm4 = vcmask 523264  }
   0xa   :  { %v2426_v21 = vld [vmem:[%s3644_s7] sm:$0xff]  ;;  %v2083_v28 = vld [vmem:[%s3645_s8 + $0x1fc] sm:$0xf]  ;;  %v57_v33 = vld [vmem:[%s3637_s0 + $0x8] sm:$0xff]  ;;  %v2080_v34 = vor.u32 %v2448_v24, %v2077_v27  ;;  %s2669_s27 = smov 64   ;;  %vm502_vm5 = vcmask 130048  }
   0xb   :  { %99 = vmatpush.bf16.msra.mxu3 %v2422_v1  ;;  %v2450_v22 = vld [vmem:[%s3645_s8 + $0x200] sm:$0xf]  ;;  %v2449_v35 = vld [vmem:[%s3645_s8 + $0x1d4] sm:$0xf0]  ;;  %v2446_v36 = vld [vmem:[%s3645_s8 + $0x170] sm:$0xf] }
   0xc   :  { %v2088_v26 = vor.u32 %v2450_v22, %v2085_v23  ;;  %v2451_v29 = vld [vmem:[%s3645_s8 + $0x21c] sm:$0xf0]  ;;  %v2069_v37 = vld [vmem:[%s3645_s8 + $0x190] sm:$0xf0]  ;;  %v2076_v38 = vor.u32 %v2449_v35, %v2075_v31  ;;  %v2022_v39 = vld [vmem:[%s3645_s8 + $0x1f8] sm:$0xf] }
   0xd   :  { %216 = vmatpush.bf16.msra.mxu2 %v2426_v21  ;;  %v2084_v30 = vor.u32 %v2451_v29, %v2083_v28  ;;  %v56_v32 = vld [vmem:[%s3637_s0] sm:$0xff]  ;;  %v2067_v40 = vld [vmem:[%s3645_s8 + $0x16c] sm:$0xf]  ;;  %v2447_v41 = vld [vmem:[%s3645_s8 + $0x18c] sm:$0xf0]  ;;  %v2072_v47 = vor.u32 %v2446_v36, %v2069_v37  ;;  %v2841_v54 = vstv %s2778_s23  ;;  %s2672_s14 = smov 128  }
   0xe   :  { %v2435_v42 = vld [vmem:[%s3645_s8 + $0x218] sm:$0xf0]  ;;  %v2018_v45 = vld [vmem:[%s3645_s8 + $0x1b0] sm:$0xf]  ;;  %v2434_v48 = vld [vmem:[%s3645_s8 + $0x1d0] sm:$0xf0]  ;;  %v2068_v52 = vor.u32 %v2447_v41, %v2067_v40 }
   0xf   :  { %100 = vmatpush.bf16.msra.mxu3 %v2421_v2  ;;  %v2023_v44 = vor.u32 %v2435_v42, %v2022_v39  ;;  %v2444_v50 = vld [vmem:[%s3645_s8 + $0x128] sm:$0xf]  ;;  %v2061_v51 = vld [vmem:[%s3645_s8 + $0x148] sm:$0xf0]  ;;  %v2019_v53 = vor.u32 %v2434_v48, %v2018_v45  ;;  %v2059_v56 = vld [vmem:[%s3645_s8 + $0x124] sm:$0xf] }
  0x10   :  { %v2445_v57 = vld [vmem:[%s3645_s8 + $0x144] sm:$0xf0]  ;;  %v2433_v60 = vld [vmem:[%s3645_s8 + $0x188] sm:$0xf0]  ;;  %v2064_v61 = vor.u32 %v2444_v50, %v2061_v51  ;;  %v2442_v0 = vld [vmem:[%s3645_s8 + $0xe0] sm:$0xf] }
  0x11   :  { %434 = vmatpush.bf16.msrb.mxu2 %v2088_v26  ;;  %v2014_v59 = vld [vmem:[%s3645_s8 + $0x168] sm:$0xf]  ;;  %v2053_v1 = vld [vmem:[%s3645_s8 + $0x100] sm:$0xf0]  ;;  %v2060_v2 = vor.u32 %v2445_v57, %v2059_v56  ;;  %v2051_v3 = vld [vmem:[%s3645_s8 + $0xdc] sm:$0xf] }
  0x12   :  { %1971 = vmatmul.msk.bf16.vlgmr.msra.gmra.mxu3 %vm89_vm0, %v63_v4  ;;  %v2443_v4 = vld [vmem:[%s3645_s8 + $0xfc] sm:$0xf0]  ;;  %v2431_v20 = vld [vmem:[%s3645_s8 + $0xf8] sm:$0xf0]  ;;  %v58_v21 = vld [vmem:[%s3637_s0 + $0x10] sm:$0xff]  ;;  %s2673_s15 = smov 8  }
  0x13   :  { %295 = vmatpush.bf16.msrb.mxu3 %v2023_v44  ;;  %v2438_v23 = vld [vmem:[%s3645_s8 + $0x50] sm:$0xf]  ;;  %v2037_v24 = vld [vmem:[%s3645_s8 + $0x70] sm:$0xf0]  ;;  %v59_v26 = vld [vmem:[%s3637_s0 + $0x18] sm:$0xff] }
  0x14   :  { %v2035_v27 = vld [vmem:[%s3645_s8 + $0x4c] sm:$0xf]  ;;  %v2439_v28 = vld [vmem:[%s3645_s8 + $0x6c] sm:$0xf0]  ;;  %v2040_v31 = vor.u32 %v2438_v23, %v2037_v24  ;;  %v314_v41 = vld [vmem:[%s3639_s2] sm:$0xff] }
  0x15   :  { %435 = vmatpush.bf16.msrb.mxu2 %v2080_v34  ;;  %v2436_v34 = vld [vmem:[%s3645_s8 + $0x8] sm:$0xf]  ;;  %v2029_v35 = vld [vmem:[%s3645_s8 + $0x28] sm:$0xf0]  ;;  %v2036_v36 = vor.u32 %v2439_v28, %v2035_v27  ;;  %v2027_v44 = vld [vmem:[%s3645_s8 + $0x4] sm:$0xf] }
  0x16   :  { %v315_v42 = vld [vmem:[%s3639_s2 + $0x8] sm:$0xff]  ;;  %v2430_v48 = vld [vmem:[%s3645_s8 + $0xb0] sm:$0xf0]  ;;  %v189_v57 = vld [vmem:[%s3647_s10 + $0x1] ss:$0 sm:$0xff] }
  0x17   :  { %296 = vmatpush.bf16.msrb.mxu3 %v2019_v53  ;;  %v2437_v45 = vld [vmem:[%s3645_s8 + $0x24] sm:$0xf0]  ;;  %v2429_v51 = vld [vmem:[%s3645_s8 + $0x68] sm:$0xf0]  ;;  %v1994_v53 = vld [vmem:[%s3645_s8] sm:$0xf] }
  0x18   :  { %v1998_v50 = vld [vmem:[%s3645_s8 + $0x48] sm:$0xf] }
  0x19   :  { %436 = vmatpush.bf16.msrb.mxu2 %v2072_v47  ;;  %v2002_v47 = vld [vmem:[%s3645_s8 + $0x90] sm:$0xf] }
  0x1d   :  { %437 = vmatpush.bf16.msrb.mxu2 %v2064_v61 }
  0x95   :  { %v102_v6 = vpop.f32.mrf.mxu3 }
  0x96   :  { %v103_v7 = vadd.f32 %v102_v6, %v70_v5  ;;  %v2015_v5 = vor.u32 %v2433_v60, %v2014_v59 }
  0x98   :  { %v106_v8 = vmul.f32 0.0033333334, %v103_v7  ;;  %v2010_v7 = vld [vmem:[%s3645_s8 + $0x120] sm:$0xf]  ;;  %297 = vmatpush.bf16.msrb.mxu3 %v2015_v5 }
  0x9a   :  { %2549 = vtanh.f32 %v106_v8  ;;  %v2432_v8 = vld [vmem:[%s3645_s8 + $0x140] sm:$0xf0] }
  0x9d   :  { %v104_v9 = vpop.f32.mrf.mxu3 }
  0x9e   :  { %v2056_v9 = vor.u32 %v2442_v0, %v2053_v1 }
  0xa0   :  { %v2550_v10 = vpop.eup %2549  ;;  %438 = vmatpush.bf16.msrb.mxu2 %v2056_v9 }
  0xa1   :  { %v108_v11 = vmul.f32 300.0, %v2550_v10  ;;  %v2440_v10 = vld [vmem:[%s3645_s8 + $0x98] sm:$0xf] }
  0xa3   :  { %v113_v12 = vpack.c.bf16 %v108_v11, %v108_v11  ;;  %v2045_v11 = vld [vmem:[%s3645_s8 + $0xb8] sm:$0xf0] }
  0xa4   :  { %v2048_v22 = vor.u32 %v2440_v10, %v2045_v11 }
  0xa5   :  { %v133_v13 = vsel %vm131_vm1, %v113_v12, 0  ;;  %v2052_v12 = vor.u32 %v2443_v4, %v2051_v3  ;;  %v2024_v4 = vld [vmem:[%s3647_s10 + $0x3] ss:$8 sm:$0x3] }
  0xa6   :  { %142 = vmatpush.bf16.msra.mxu1 %v133_v13  ;;  %439 = vmatpush.bf16.msrb.mxu2 %v2048_v22  ;;  %v336_v5 = vperm.slane %v2024_v4, 0 }
  0xa9   :  { %1980 = vmatmul.msk.bf16.vlgmr.msra.gmra.mxu1 %vm124_vm2, %v2424_v14  ;;  %v2043_v14 = vld [vmem:[%s3645_s8 + $0x94] sm:$0xf] }
  0xaa   :  { %420 = vmatpush.bf16.msrb.mxu1 %v2084_v30  ;;  %440 = vmatpush.bf16.msrb.mxu2 %v2040_v31 }
  0xae   :  { %421 = vmatpush.bf16.msrb.mxu1 %v2076_v38 }
  0xb2   :  { %422 = vmatpush.bf16.msrb.mxu1 %v2068_v52  ;;  %v1999_v52 = vor.u32 %v2429_v51, %v1998_v50 }
  0xb6   :  { %423 = vmatpush.bf16.msrb.mxu1 %v2060_v2 }
  0xb9   :  { %1981 = vmatmul.msk.bf16.gmra.mxu1 %vm124_vm2, %v2425_v15  ;;  %v2441_v15 = vld [vmem:[%s3645_s8 + $0xb4] sm:$0xf0] }
  0xba   :  { %424 = vmatpush.bf16.msrb.mxu1 %v2052_v12 }
 0x126   :  { %v144_v16 = vpop.f32.mrf.mxu1 }
 0x127   :  { %162 = vrot.lane.b32.xlu0 %v144_v16, %s2668_s18  ;;  %v154_v43 = vmul.f32 %v144_v16, %v56_v32  ;;  %v2011_v16 = vor.u32 %v2432_v8, %v2010_v7 }
 0x129   :  { %298 = vmatpush.bf16.msrb.mxu3 %v2011_v16 }
 0x12e   :  { %v146_v17 = vpop.f32.mrf.mxu1 }
 0x12f   :  { %164 = vrot.lane.b32.xlu0 %v146_v17, %s2668_s18  ;;  %v155_v46 = vmul.f32 %v146_v17, %v57_v33  ;;  %v2006_v17 = vld [vmem:[%s3645_s8 + $0xd8] sm:$0xf] }
 0x130   :  { %v2007_v29 = vor.u32 %v2431_v20, %v2006_v17 }
 0x132   :  { %299 = vmatpush.bf16.msrb.mxu3 %v2007_v29 }
 0x136   :  { %v2766_v18 = vpop.f32.mrf.mxu1 }
 0x137   :  { %166 = vrot.lane.b32.xlu1 %v2766_v18, %s2668_s18  ;;  %v156_v30 = vmul.f32 %v2766_v18, %v58_v21  ;;  %v2032_v18 = vor.u32 %v2436_v34, %v2029_v35 }
 0x139   :  { %441 = vmatpush.bf16.msrb.mxu2 %v2032_v18 }
 0x13e   :  { %v2769_v19 = vpop.f32.mrf.mxu1 }
 0x13f   :  { %168 = vrot.lane.b32.xlu1 %v2769_v19, %s2668_s18  ;;  %v157_v32 = vmul.f32 %v2769_v19, %v59_v26  ;;  %v246_v26 = vld [vmem:[%s3647_s10 + $0x2] ss:$0 sm:$0xff] }
 0x199   :  { %v163_v25 = vpop.permute.xlu0 %162 }
 0x19a   :  { %v174_v49 = vadd.f32 %v163_v25, %v154_v43  ;;  %v2044_v25 = vor.u32 %v2441_v15, %v2043_v14  ;;  %v316_v43 = vpack.c.bf16 %v315_v42, %v314_v41 }
 0x19c   :  { %v179_v62 = vmul.f32 %v2841_v54, %v174_v49  ;;  %425 = vmatpush.bf16.msrb.mxu1 %v2044_v25  ;;  %v2003_v49 = vor.u32 %v2430_v48, %v2002_v47 }
 0x19e   :  { %300 = vmatpush.bf16.msrb.mxu3 %v2003_v49 }
 0x1a0   :  { %426 = vmatpush.bf16.msrb.mxu1 %v2036_v36 }
 0x1a1   :  { %v165_v55 = vpop.permute.xlu0 %164 }
 0x1a2   :  { %v175_v58 = vadd.f32 %v165_v55, %v155_v46  ;;  %v2028_v46 = vor.u32 %v2437_v45, %v2027_v44  ;;  %301 = vmatpush.bf16.msrb.mxu3 %v1999_v52  ;;  %v455_v52 = vld [vmem:[%s3640_s3 + $0x8] sm:$0xff] }
 0x1a4   :  { %v180_v63 = vmul.f32 %v2841_v54, %v175_v58  ;;  %427 = vmatpush.bf16.msrb.mxu1 %v2028_v46  ;;  %v454_v46 = vld [vmem:[%s3640_s3] sm:$0xff] }
 0x1a6   :  { %v183_v6 = vpack.c.bf16 %v180_v63, %v179_v62 }
 0x1a7   :  { %428 = vmatmul.bf16.vlgmr.msrb.gmra.mxu1 %v316_v43 }
 0x1a8   :  { %1990 = vmatmul.msk.bf16.vlgmr.msra.gmra.mxu2 %vm202_vm3, %v183_v6  ;;  %v337_v6 = vperm.slane %v2024_v4, 1 }
 0x1a9   :  { %v167_v13 = vpop.permute.xlu1 %166 }
 0x1aa   :  { %v176_v33 = vadd.f32 %v167_v13, %v156_v30 }
 0x1ac   :  { %v181_v39 = vmul.f32 %v2841_v54, %v176_v33 }
 0x1b1   :  { %v169_v37 = vpop.permute.xlu1 %168 }
 0x1b2   :  { %v177_v38 = vadd.f32 %v169_v37, %v157_v32 }
 0x1b4   :  { %v182_v19 = vmul.f32 %v2841_v54, %v177_v38  ;;  %v2428_v54 = vld [vmem:[%s3645_s8 + $0x20] sm:$0xf0] }
 0x1b5   :  { %v1995_v55 = vor.u32 %v2428_v54, %v1994_v53 }
 0x1b6   :  { %v184_v40 = vpack.c.bf16 %v182_v19, %v181_v39 }
 0x1b7   :  { %302 = vmatpush.bf16.msrb.mxu3 %v1995_v55 }
 0x1b8   :  { %1991 = vmatmul.msk.bf16.gmra.mxu2 %vm202_vm3, %v184_v40 }
 0x1c8   :  { %442 = vmatmul.bf16.vlgmr.msrb.gmra.mxu2 %v316_v43 }
 0x224   :  { %v429_v7 = vpop.f32.mrf.mxu1 }
 0x225   :  { %v430_v8 = vadd.f32 %v429_v7, %v336_v5 }
 0x22b   :  { %v218_v56 = vpop.f32.mrf.mxu2 }
 0x22c   :  { %v2956_v59 = vadd.f32 %v218_v56, %v189_v57  ;;  %v431_v13 = vpop.f32.mrf.mxu1 }
 0x22d   :  { %v432_v14 = vadd.f32 %v431_v13, %v336_v5 }
 0x233   :  { %v220_v58 = vpop.f32.mrf.mxu2 }
 0x234   :  { %v2958_v60 = vadd.f32 %v220_v58, %v189_v57 }
 0x236   :  { %v228_v61 = vpack.c.bf16 %v2958_v60, %v2956_v59 }
 0x238   :  { %303 = vmatmul.bf16.vlgmr.msrb.gmra.mxu3 %v228_v61 }
 0x23b   :  { %v223_v62 = vpop.f32.mrf.mxu2 }
 0x23c   :  { %v2962_v0 = vadd.f32 %v223_v62, %v189_v57 }
 0x243   :  { %v225_v63 = vpop.f32.mrf.mxu2 }
 0x244   :  { %v2964_v1 = vadd.f32 %v225_v63, %v189_v57  ;;  %v456_v57 = vld [vmem:[%s3640_s3 + $0x10] sm:$0xff]  ;;  %v457_v63 = vld [vmem:[%s3640_s3 + $0x18] sm:$0xff] }
 0x246   :  { %v229_v2 = vpack.c.bf16 %v2964_v1, %v2962_v0 }
 0x248   :  { %308 = vmatmul.bf16.gmra.mxu3 %v229_v2 }
 0x24b   :  { %v443_v3 = vpop.f32.mrf.mxu2 }
 0x24c   :  { %v444_v9 = vadd.f32 %v443_v3, %v337_v6 }
 0x24e   :  { %v452_v11 = vpack.c.bf16 %v444_v9, %v430_v8 }
 0x250   :  { %v549_v15 = vunpack.c.h.b16 %v452_v11  ;;  %v470_v20 = vunpack.c.l.b16 %v452_v11 }
 0x253   :  { %v445_v10 = vpop.f32.mrf.mxu2 }
 0x254   :  { %v446_v12 = vadd.f32 %v445_v10, %v337_v6 }
 0x256   :  { %v453_v16 = vpack.c.bf16 %v446_v12, %v432_v14 }
 0x258   :  { %v550_v17 = vunpack.c.h.b16 %v453_v16  ;;  %v471_v21 = vunpack.c.l.b16 %v453_v16 }
 0x25a   :  { %v2971_v22 = vpack.c.b16 %v550_v17, %v549_v15  ;;  %v472_v23 = vpack.c.b16 %v471_v21, %v470_v20 }
 0x25c   :  { %566 = vmatpush.bf16.msra.mxu1 %v2971_v22  ;;  %582 = vrot.lane.b32.xlu2 %v472_v23, %s2669_s27  ;;  %v481_v24 = vsel %vm473_vm4, %v472_v23, 0 }
 0x25d   :  { %490 = vmatpush.bf16.xpose.msra.mxu0 %v481_v24 }
 0x2b6   :  { %v583_v42 = vpop.permute.xlu2 %582 }
 0x2b7   :  { %v591_v43 = vsel %vm473_vm4, %v583_v42, 0 }
 0x2b8   :  { %600 = vmatpush.bf16.xpose.msra.mxu2 %v591_v43 }
 0x2bb   :  { %v304_v25 = vpop.f32.mrf.mxu3 }
 0x2bc   :  { %v305_v27 = vadd.f32 %v304_v25, %v246_v26 }
 0x2be   :  { %v448_v29 = vpack.c.bf16 %v305_v27, %v305_v27 }
 0x2c0   :  { %v462_v32 = vunpack.c.l.b16 %v448_v29 }
 0x2c3   :  { %v306_v28 = vpop.f32.mrf.mxu3 }
 0x2c4   :  { %v307_v30 = vadd.f32 %v306_v28, %v246_v26 }
 0x2c6   :  { %v449_v31 = vpack.c.bf16 %v307_v30, %v307_v30 }
 0x2c8   :  { %v463_v33 = vunpack.c.l.b16 %v449_v31 }
 0x2ca   :  { %v466_v34 = vpack.c.b16 %v463_v33, %v462_v32 }
 0x2cb   :  { %v309_v35 = vpop.f32.mrf.mxu3 }
 0x2cc   :  { %578 = vrot.lane.b32.xlu2 %v466_v34, %s2669_s27  ;;  %2089 = vmatmul.msk.bf16.vlgmr.msra.gmra.mxu0 %vm473_vm4, %v466_v34  ;;  %v310_v36 = vadd.f32 %v309_v35, %v246_v26 }
 0x2ce   :  { %v450_v38 = vpack.c.bf16 %v310_v36, %v310_v36 }
 0x2d0   :  { %v464_v19 = vunpack.c.l.b16 %v450_v38 }
 0x2d3   :  { %v311_v37 = vpop.f32.mrf.mxu3 }
 0x2d4   :  { %v312_v18 = vadd.f32 %v311_v37, %v246_v26 }
 0x2d6   :  { %v451_v39 = vpack.c.bf16 %v312_v18, %v312_v18 }
 0x2d8   :  { %v465_v40 = vunpack.c.l.b16 %v451_v39 }
 0x2da   :  { %v467_v41 = vpack.c.b16 %v465_v40, %v464_v19 }
 0x2dc   :  { %580 = vrot.lane.b32.xlu0 %v467_v41, %s2669_s27  ;;  %2090 = vmatmul.msk.bf16.gmra.mxu0 %vm473_vm4, %v467_v41 }
 0x326   :  { %v579_v44 = vpop.permute.xlu2 %578 }
 0x327   :  { %2093 = vmatmul.msk.bf16.vlgmr.msra.gmra.mxu2 %vm473_vm4, %v579_v44 }
 0x349   :  { %v492_v50 = vpop.f32.mrf.mxu0 }
 0x34a   :  { %v493_v51 = vadd.f32 %v492_v50, %v454_v46 }
 0x34c   :  { %v503_v56 = vsel %vm502_vm5, %v493_v51, -inf }
 0x34e   :  { %v581_v45 = vpop.permute.xlu0 %580 }
 0x34f   :  { %2094 = vmatmul.msk.bf16.gmra.mxu2 %vm473_vm4, %v581_v45 }
 0x351   :  { %v494_v4 = vpop.f32.mrf.mxu0 }
 0x352   :  { %v495_v6 = vadd.f32 %v494_v4, %v455_v52 }
 0x354   :  { %v506_v7 = vsel %vm502_vm5, %v495_v6, -inf }
 0x359   :  { %v497_v8 = vpop.f32.mrf.mxu0 }
 0x35a   :  { %v498_v9 = vadd.f32 %v497_v8, %v456_v57 }
 0x35c   :  { %v509_v10 = vsel %vm502_vm5, %v498_v9, -inf }
 0x361   :  { %v499_v21 = vpop.f32.mrf.mxu0 }
 0x362   :  { %v500_v23 = vadd.f32 %v499_v21, %v457_v63 }
 0x364   :  { %v512_v25 = vsel %vm502_vm5, %v500_v23, -inf }
 0x3aa   :  { %v602_v47 = vpop.f32.mrf.mxu2 }
 0x3ab   :  { %v603_v48 = vadd.f32 %v602_v47, %v454_v46 }
 0x3ad   :  { %v612_v49 = vsel %vm502_vm5, %v603_v48, -inf }
 0x3ae   :  { %613 = vmax.xlane.f32.xlu1 %v612_v49 }
 0x3b2   :  { %v604_v53 = vpop.f32.mrf.mxu2 }
 0x3b3   :  { %v605_v54 = vadd.f32 %v604_v53, %v455_v52 }
 0x3b5   :  { %v615_v55 = vsel %vm502_vm5, %v605_v54, -inf }
 0x3b6   :  { %616 = vmax.xlane.f32.xlu2 %v615_v55  ;;  %504 = vmax.xlane.f32.xlu1 %v503_v56 }
 0x3d2   :  { %v607_v58 = vpop.f32.mrf.mxu2 }
 0x3d3   :  { %v608_v61 = vadd.f32 %v607_v58, %v456_v57 }
 0x3d5   :  { %v618_v62 = vsel %vm502_vm5, %v608_v61, -inf }
 0x3d6   :  { %619 = vmax.xlane.f32.xlu0 %v618_v62 }
 0x3da   :  { %v609_v2 = vpop.f32.mrf.mxu2 }
 0x3db   :  { %v610_v3 = vadd.f32 %v609_v2, %v457_v63 }
 0x3dd   :  { %v621_v5 = vsel %vm502_vm5, %v610_v3, -inf }
 0x3de   :  { %622 = vmax.xlane.f32.xlu2 %v621_v5 }
 0x3e6   :  { %507 = vmax.xlane.f32.xlu2 %v506_v7 }
 0x3ee   :  { %510 = vmax.xlane.f32.xlu2 %v509_v10 }
 0x421   :  { %v614_v11 = vpop.xlane.xlu1 %613 }
 0x422   :  { %v624_v12 = vsub.f32 %v603_v48, %v614_v11 }
 0x424   :  { %v628_v13 = vmul.f32 1.442695, %v624_v12 }
 0x426   :  { %2551 = vpow2.f32 %v628_v13 }
 0x429   :  { %v617_v14 = vpop.xlane.xlu2 %616  ;;  %v505_v27 = vpop.xlane.xlu1 %504 }
 0x42a   :  { %v625_v15 = vsub.f32 %v605_v54, %v617_v14  ;;  %v515_v30 = vsub.f32 %v493_v51, %v505_v27 }
 0x42c   :  { %v2552_v16 = vpop.eup %2551  ;;  %v630_v17 = vmul.f32 1.442695, %v625_v15  ;;  %v519_v32 = vmul.f32 1.442695, %v515_v30  ;;  %v2123_v30 = vld [vmem:[%s3645_s8 + $0x1bc] sm:$0xf] }
 0x42d   :  { %v636_v20 = vsel %vm502_vm5, %v2552_v16, 0.0 }
 0x42e   :  { %2553 = vpow2.f32 %v630_v17  ;;  %637 = vadd.xlane.f32.xlu0 %v636_v20 }
 0x434   :  { %v2554_v24 = vpop.eup %2553 }
 0x435   :  { %v639_v26 = vsel %vm502_vm5, %v2554_v24, 0.0 }
 0x436   :  { %513 = vmax.xlane.f32.xlu0 %v512_v25  ;;  %640 = vadd.xlane.f32.xlu1 %v639_v26 }
 0x449   :  { %v620_v28 = vpop.xlane.xlu0 %619 }
 0x44a   :  { %v626_v29 = vsub.f32 %v608_v61, %v620_v28  ;;  %v2127_v28 = vld [vmem:[%s3645_s8 + $0x204] sm:$0xf] }
 0x44c   :  { %v632_v31 = vmul.f32 1.442695, %v626_v29  ;;  %v2459_v29 = vld [vmem:[%s3645_s8 + $0x224] sm:$0xf0] }
 0x44e   :  { %2555 = vpow2.f32 %v632_v31 }
 0x44f   :  { %658 = vrot.lane.b32.xlu1 %v2971_v22, %s2669_s27  ;;  %2557 = vpow2.f32 %v519_v32  ;;  %v2128_v32 = vor.u32 %v2459_v29, %v2127_v28 }
 0x451   :  { %v623_v33 = vpop.xlane.xlu2 %622  ;;  %773 = vmatpush.bf16.msra.mxu3 %v2128_v32 }
 0x452   :  { %v627_v34 = vsub.f32 %v610_v3, %v623_v33  ;;  %v2458_v33 = vld [vmem:[%s3645_s8 + $0x1dc] sm:$0xf0] }
 0x454   :  { %v2556_v35 = vpop.eup %2555  ;;  %v634_v36 = vmul.f32 1.442695, %v627_v34  ;;  %v2124_v34 = vor.u32 %v2458_v33, %v2123_v30 }
 0x455   :  { %v642_v37 = vsel %vm502_vm5, %v2556_v35, 0.0  ;;  %v2558_v18 = vpop.eup %2557 }
 0x456   :  { %2559 = vpow2.f32 %v634_v36  ;;  %643 = vadd.xlane.f32.xlu2 %v642_v37  ;;  %v527_v42 = vsel %vm502_vm5, %v2558_v18, 0.0  ;;  %v2457_v36 = vld [vmem:[%s3645_s8 + $0x194] sm:$0xf0]  ;;  %774 = vmatpush.bf16.msra.mxu3 %v2124_v34 }
 0x459   :  { %v508_v38 = vpop.xlane.xlu2 %507 }
 0x45a   :  { %v516_v39 = vsub.f32 %v495_v6, %v508_v38 }
 0x45c   :  { %v2560_v19 = vpop.eup %2559  ;;  %v521_v40 = vmul.f32 1.442695, %v516_v39 }
 0x45d   :  { %v645_v41 = vsel %vm502_vm5, %v2560_v19, 0.0 }
 0x45e   :  { %2561 = vpow2.f32 %v521_v40  ;;  %646 = vadd.xlane.f32.xlu0 %v645_v41  ;;  %528 = vadd.xlane.f32.xlu2 %v527_v42  ;;  %v2456_v40 = vld [vmem:[%s3645_s8 + $0x14c] sm:$0xf0]  ;;  %v2111_v42 = vld [vmem:[%s3645_s8 + $0xe4] sm:$0xf] }
 0x461   :  { %v511_v22 = vpop.xlane.xlu2 %510 }
 0x462   :  { %v517_v43 = vsub.f32 %v498_v9, %v511_v22  ;;  %v2455_v22 = vld [vmem:[%s3645_s8 + $0x104] sm:$0xf0] }
 0x464   :  { %v2562_v44 = vpop.eup %2561  ;;  %v523_v45 = vmul.f32 1.442695, %v517_v43  ;;  %v2112_v43 = vor.u32 %v2455_v22, %v2111_v42  ;;  %v2244_v42 = vld [vmem:[%s3645_s8 + $0x208] sm:$0xf]  ;;  %v2490_v22 = vld [vmem:[%s3645_s8 + $0x228] sm:$0xf0] }
 0x465   :  { %v530_v46 = vsel %vm502_vm5, %v2562_v44, 0.0 }
 0x466   :  { %2563 = vpow2.f32 %v523_v45  ;;  %531 = vadd.xlane.f32.xlu0 %v530_v46  ;;  %v2454_v45 = vld [vmem:[%s3645_s8 + $0xbc] sm:$0xf0] }
 0x46c   :  { %v2564_v47 = vpop.eup %2563 }
 0x46d   :  { %v533_v48 = vsel %vm502_vm5, %v2564_v47, 0.0 }
 0x46e   :  { %534 = vadd.xlane.f32.xlu2 %v533_v48  ;;  %v2453_v48 = vld [vmem:[%s3645_s8 + $0x74] sm:$0xf0] }
 0x4a1   :  { %v638_v49 = vpop.xlane.xlu0 %637 }
 0x4a9   :  { %v514_v50 = vpop.xlane.xlu0 %513  ;;  %v641_v53 = vpop.xlane.xlu1 %640 }
 0x4aa   :  { %v518_v51 = vsub.f32 %v500_v23, %v514_v50  ;;  %v2099_v50 = vld [vmem:[%s3645_s8 + $0xc] sm:$0xf] }
 0x4ac   :  { %v525_v52 = vmul.f32 1.442695, %v518_v51  ;;  %v2452_v51 = vld [vmem:[%s3645_s8 + $0x2c] sm:$0xf0] }
 0x4ae   :  { %2565 = vpow2.f32 %v525_v52  ;;  %v2100_v52 = vor.u32 %v2452_v51, %v2099_v50  ;;  %v2489_v50 = vld [vmem:[%s3645_s8 + $0x214] sm:$0xf]  ;;  %v2254_v51 = vld [vmem:[%s3645_s8 + $0x234] sm:$0xf0] }
 0x4af   :  { %2567 = vrcp.f32 %v641_v53 }
 0x4b0   :  { %2569 = vrcp.f32 %v638_v49 }
 0x4b4   :  { %v2566_v54 = vpop.eup %2565 }
 0x4b5   :  { %v536_v55 = vsel %vm502_vm5, %v2566_v54, 0.0  ;;  %v2568_v56 = vpop.eup %2567 }
 0x4b6   :  { %537 = vadd.xlane.f32.xlu0 %v536_v55  ;;  %v2570_v57 = vpop.eup %2569  ;;  %v653_v58 = vmul.f32 %v2568_v56, %v2554_v24 }
 0x4b7   :  { %v652_v61 = vmul.f32 %v2570_v57, %v2552_v16 }
 0x4b9   :  { %v656_v63 = vpack.c.bf16 %v653_v58, %v652_v61 }
 0x4c1   :  { %v659_v62 = vpop.permute.xlu1 %658 }
 0x4c2   :  { %674 = vmatpush.bf16.msrb.mxu0 %v659_v62 }
 0x4c5   :  { %2095 = vmatmul.msk.bf16.vlgmr.msrb.gmra.mxu0 %vm502_vm5, %v656_v63 }
 0x4c9   :  { %v644_v2 = vpop.xlane.xlu2 %643 }
 0x4ca   :  { %2571 = vrcp.f32 %v644_v2 }
 0x4d0   :  { %v2572_v5 = vpop.eup %2571 }
 0x4d1   :  { %v647_v3 = vpop.xlane.xlu0 %646  ;;  %v529_v4 = vpop.xlane.xlu2 %528  ;;  %v654_v8 = vmul.f32 %v2572_v5, %v2556_v35  ;;  %v2119_v35 = vld [vmem:[%s3645_s8 + $0x174] sm:$0xf] }
 0x4d2   :  { %2573 = vrcp.f32 %v647_v3  ;;  %v2120_v37 = vor.u32 %v2457_v36, %v2119_v35 }
 0x4d3   :  { %2575 = vrcp.f32 %v529_v4 }
 0x4d4   :  { %775 = vmatpush.bf16.msra.mxu3 %v2120_v37 }
 0x4d8   :  { %v2574_v6 = vpop.eup %2573 }
 0x4d9   :  { %v532_v7 = vpop.xlane.xlu0 %531  ;;  %v655_v9 = vmul.f32 %v2574_v6, %v2560_v19  ;;  %v2576_v11 = vpop.eup %2575  ;;  %v2115_v19 = vld [vmem:[%s3645_s8 + $0x12c] sm:$0xf] }
 0x4da   :  { %2577 = vrcp.f32 %v532_v7  ;;  %v543_v13 = vmul.f32 %v2576_v11, %v2558_v18  ;;  %v2116_v41 = vor.u32 %v2456_v40, %v2115_v19 }
 0x4db   :  { %v657_v10 = vpack.c.bf16 %v655_v9, %v654_v8  ;;  %v724_v9 = vld [vmem:[%s3647_s10 + $0x4] ss:$0 sm:$0xff] }
 0x4dc   :  { %776 = vmatpush.bf16.msra.mxu3 %v2116_v41 }
 0x4dd   :  { %2096 = vmatmul.msk.bf16.gmra.mxu0 %vm502_vm5, %v657_v10 }
 0x4e0   :  { %v2578_v12 = vpop.eup %2577  ;;  %777 = vmatpush.bf16.msra.mxu3 %v2112_v43  ;;  %v2488_v43 = vld [vmem:[%s3645_s8 + $0x20c] sm:$0xf] }
 0x4e1   :  { %v544_v14 = vmul.f32 %v2578_v12, %v2562_v44  ;;  %v535_v16 = vpop.xlane.xlu2 %534  ;;  %v2107_v44 = vld [vmem:[%s3645_s8 + $0x9c] sm:$0xf] }
 0x4e2   :  { %2579 = vrcp.f32 %v535_v16  ;;  %v2108_v46 = vor.u32 %v2454_v45, %v2107_v44  ;;  %v2245_v44 = vor.u32 %v2490_v22, %v2244_v42  ;;  %v2246_v45 = vld [vmem:[%s3645_s8 + $0x22c] sm:$0xf0]  ;;  %v2164_v22 = vld [vmem:[%s3645_s8 + $0xa0] sm:$0xf] }
 0x4e3   :  { %v547_v15 = vpack.c.bf16 %v544_v14, %v543_v13 }
 0x4e4   :  { %778 = vmatpush.bf16.msra.mxu3 %v2108_v46  ;;  %v2252_v46 = vld [vmem:[%s3645_s8 + $0x210] sm:$0xf]  ;;  %1098 = vmatpush.bf16.msrb.mxu1 %v2245_v44  ;;  %v2468_v44 = vld [vmem:[%s3645_s8 + $0xa4] sm:$0xf] }
 0x4e5   :  { %2091 = vmatmul.msk.bf16.vlgmr.msra.gmra.mxu1 %vm502_vm5, %v547_v15 }
 0x4e8   :  { %v2580_v20 = vpop.eup %2579 }
 0x4e9   :  { %v545_v23 = vmul.f32 %v2580_v20, %v2564_v47  ;;  %v2103_v47 = vld [vmem:[%s3645_s8 + $0x54] sm:$0xf] }
 0x4ea   :  { %v2104_v49 = vor.u32 %v2453_v48, %v2103_v47  ;;  %v2491_v47 = vld [vmem:[%s3645_s8 + $0x230] sm:$0xf0]  ;;  %v2249_v48 = vor.u32 %v2488_v43, %v2246_v45  ;;  %v2470_v43 = vld [vmem:[%s3645_s8 + $0xc0] sm:$0xf0] }
 0x4eb   :  { %v2165_v45 = vor.u32 %v2470_v43, %v2164_v22  ;;  %v2515_v22 = vld [vmem:[%s3646_s9 + $0xb8] sm:$0xff] }
 0x4ec   :  { %779 = vmatpush.bf16.msra.mxu3 %v2104_v49  ;;  %v2253_v49 = vor.u32 %v2491_v47, %v2252_v46  ;;  %1117 = vmatpush.bf16.msrb.mxu2 %v2249_v48  ;;  %v2166_v46 = vld [vmem:[%s3645_s8 + $0xc4] sm:$0xf0]  ;;  %v2471_v48 = vld [vmem:[%s3645_s8 + $0xc8] sm:$0xf0] }
 0x4ed   :  { %v2172_v47 = vld [vmem:[%s3645_s8 + $0xa8] sm:$0xf] }
 0x4ee   :  { %1136 = vmatpush.bf16.msra.mxu0 %v2253_v49  ;;  %v2169_v49 = vor.u32 %v2468_v44, %v2166_v46  ;;  %v2507_v44 = vld [vmem:[%s3646_s9 + $0x78] sm:$0xff] }
 0x4f0   :  { %780 = vmatpush.bf16.msra.mxu3 %v2100_v52  ;;  %v2257_v52 = vor.u32 %v2489_v50, %v2254_v51  ;;  %v2173_v50 = vor.u32 %v2471_v48, %v2172_v47  ;;  %v2469_v51 = vld [vmem:[%s3645_s8 + $0xac] sm:$0xf]  ;;  %v2498_v47 = vld [vmem:[%s3646_s9 + $0x30] sm:$0xff] }
 0x4f1   :  { %v2514_v48 = vld [vmem:[%s3646_s9 + $0xb0] sm:$0xff] }
 0x4f4   :  { %1155 = vmatpush.bf16.msrb.mxu3 %v2257_v52  ;;  %v2174_v52 = vld [vmem:[%s3645_s8 + $0xcc] sm:$0xf0] }
 0x529   :  { %v538_v17 = vpop.xlane.xlu0 %537 }
 0x52a   :  { %2581 = vrcp.f32 %v538_v17 }
 0x530   :  { %v2582_v21 = vpop.eup %2581 }
 0x531   :  { %v546_v24 = vmul.f32 %v2582_v21, %v2566_v54 }
 0x533   :  { %v548_v25 = vpack.c.bf16 %v546_v24, %v545_v23 }
 0x535   :  { %2092 = vmatmul.msk.bf16.gmra.mxu1 %vm502_vm5, %v548_v25  ;;  %v2670_v25 = vmov 128.0  }
 0x536   :  { %2583 = vrcp.f32 %v2670_v25  ;;  %v2204_v25 = vld [vmem:[%s3645_s8 + $0x138] sm:$0xf] }
 0x542   :  { %v676_v26 = vpop.f32.mrf.mxu0 }
 0x54a   :  { %v678_v27 = vpop.f32.mrf.mxu0 }
 0x54b   :  { %v2539_v31 = vpack.i.bf16 %v678_v27, %v676_v26  ;;  %v2584_v26 = vpop.eup %2583 }
 0x54c   :  { %vm811_vm6 = vweird.f32 %v2584_v26 }
 0x54d   :  { %2540 = vrot.lane.b32.xlu1 %v2539_v31, %s2669_s27 }
 0x55a   :  { %v681_v38 = vpop.f32.mrf.mxu0 }
 0x562   :  { %v683_v18 = vpop.f32.mrf.mxu0  ;;  %v568_v53 = vpop.f32.mrf.mxu1 }
 0x563   :  { %v2544_v39 = vpack.i.bf16 %v683_v18, %v681_v38 }
 0x565   :  { %2545 = vrot.lane.b32.xlu2 %v2544_v39, %s2669_s27  ;;  %s1945_s27 = sshll.u32 %s3649_s12, 4  ;;  %s1946_s27 = int_to_ptr.hbm [resolvable:$true] %s1945_s27 }
 0x56a   :  { %v570_v54 = vpop.f32.mrf.mxu1 }
 0x5b2   :  { %v573_v63 = vpop.f32.mrf.mxu1 }
 0x5ba   :  { %v575_v5 = vpop.f32.mrf.mxu1 }
 0x5bf   :  { %v2541_v55 = vpop.permute.xlu1 %2540  ;;  %v2546_v2 = vpop.permute.xlu2 %2545 }
 0x5c0   :  { %v2543_v56 = vunpack.i.h.bf16 %v2541_v55  ;;  %v2542_v57 = vunpack.i.l.bf16 %v2541_v55  ;;  %v2548_v3 = vunpack.i.h.bf16 %v2546_v2  ;;  %v2547_v4 = vunpack.i.l.bf16 %v2546_v2  ;;  %v2484_v55 = vld [vmem:[%s3645_s8 + $0x1c4] sm:$0xf]  ;;  %v2485_v2 = vld [vmem:[%s3645_s8 + $0x1cc] sm:$0xf] }
 0x5c2   :  { %v703_v58 = vsel %vm473_vm4, %v570_v54, %v2543_v56  ;;  %v702_v61 = vsel %vm473_vm4, %v568_v53, %v2542_v57  ;;  %v704_v6 = vsel %vm473_vm4, %v573_v63, %v2547_v4  ;;  %v705_v7 = vsel %vm473_vm4, %v575_v5, %v2548_v3  ;;  %v2228_v53 = vld [vmem:[%s3645_s8 + $0x1c0] sm:$0xf]  ;;  %v2486_v54 = vld [vmem:[%s3645_s8 + $0x1e0] sm:$0xf0]  ;;  %v2230_v57 = vld [vmem:[%s3645_s8 + $0x1e4] sm:$0xf0] }
 0x5c3   :  { %v706_v62 = vpack.c.bf16 %v703_v58, %v702_v61  ;;  %v707_v8 = vpack.c.bf16 %v705_v7, %v704_v6  ;;  %v2229_v56 = vor.u32 %v2486_v54, %v2228_v53  ;;  %v2236_v58 = vld [vmem:[%s3645_s8 + $0x1c8] sm:$0xf]  ;;  %v2487_v61 = vld [vmem:[%s3645_s8 + $0x1e8] sm:$0xf0]  ;;  %v2238_v3 = vld [vmem:[%s3645_s8 + $0x1ec] sm:$0xf0]  ;;  %v2177_v53 = vor.u32 %v2469_v51, %v2174_v52 }
 0x5c4   :  { %v2237_v63 = vor.u32 %v2487_v61, %v2236_v58  ;;  %v2241_v4 = vor.u32 %v2485_v2, %v2238_v3  ;;  %v2212_v5 = vld [vmem:[%s3645_s8 + $0x178] sm:$0xf]  ;;  %v2482_v6 = vld [vmem:[%s3645_s8 + $0x198] sm:$0xf0]  ;;  %v2150_v58 = vld [vmem:[%s3645_s8 + $0x7c] sm:$0xf0] }
 0x5c5   :  { %781 = vmatmul.bf16.vlgmr.msra.gmra.mxu3 %v706_v62  ;;  %v2233_v62 = vor.u32 %v2484_v55, %v2230_v57  ;;  %1099 = vmatpush.bf16.msrb.mxu1 %v2229_v56  ;;  %v2480_v7 = vld [vmem:[%s3645_s8 + $0x17c] sm:$0xf]  ;;  %v2148_v54 = vld [vmem:[%s3645_s8 + $0x58] sm:$0xf]  ;;  %v2156_v61 = vld [vmem:[%s3645_s8 + $0x60] sm:$0xf] }
 0x5c6   :  { %1137 = vmatpush.bf16.msra.mxu0 %v2237_v63  ;;  %1156 = vmatpush.bf16.msrb.mxu3 %v2241_v4  ;;  %v2466_v55 = vld [vmem:[%s3645_s8 + $0x78] sm:$0xf0]  ;;  %v2465_v4 = vld [vmem:[%s3645_s8 + $0x64] sm:$0xf]  ;;  %v2506_v52 = vld [vmem:[%s3646_s9 + $0x70] sm:$0xff] }
 0x5c7   :  { %1118 = vmatpush.bf16.msrb.mxu2 %v2233_v62  ;;  %v2464_v56 = vld [vmem:[%s3645_s8 + $0x5c] sm:$0xf]  ;;  %v2149_v57 = vor.u32 %v2466_v55, %v2148_v54  ;;  %v2467_v62 = vld [vmem:[%s3645_s8 + $0x80] sm:$0xf0] }
 0x5c8   :  { %v2153_v2 = vor.u32 %v2464_v56, %v2150_v58  ;;  %v2157_v3 = vor.u32 %v2467_v62, %v2156_v61  ;;  %v796_v56 = vld [vmem:[%s3647_s10 + $0x5] ss:$0 sm:$0xff]  ;;  %v2497_v58 = vld [vmem:[%s3646_s9 + $0x28] sm:$0xff] }
 0x5c9   :  { %v2513_v61 = vld [vmem:[%s3646_s9 + $0xa8] sm:$0xff] }
 0x5d5   :  { %786 = vmatmul.bf16.gmra.mxu3 %v707_v8  ;;  %v2213_v8 = vor.u32 %v2482_v6, %v2212_v5  ;;  %v2158_v5 = vld [vmem:[%s3645_s8 + $0x84] sm:$0xf0] }
 0x5d7   :  { %1100 = vmatpush.bf16.msrb.mxu1 %v2213_v8  ;;  %v2132_v8 = vld [vmem:[%s3645_s8 + $0x10] sm:$0xf] }
 0x648   :  { %v782_v10 = vpop.f32.mrf.mxu3 }
 0x649   :  { %v783_v11 = vadd.f32 %v782_v10, %v724_v9  ;;  %v2220_v10 = vld [vmem:[%s3645_s8 + $0x180] sm:$0xf] }
 0x64b   :  { %v792_v12 = vadd.f32 %v783_v11, %v2956_v59  ;;  %v807_v59 = vmul.f32 128.0, %v2584_v26  ;;  %v2483_v11 = vld [vmem:[%s3645_s8 + $0x1a0] sm:$0xf0] }
 0x64d   :  { %798 = vadd.xlane.f32.xlu0 %v792_v12  ;;  %v808_v27 = vsub.f32 1.0, %v807_v59 }
 0x64f   :  { %v809_v28 = vmul.f32 %v2584_v26, %v808_v27 }
 0x650   :  { %v784_v13 = vpop.f32.mrf.mxu3 }
 0x651   :  { %v785_v14 = vadd.f32 %v784_v13, %v724_v9  ;;  %v810_v29 = vadd.f32 %v2584_v26, %v809_v28  ;;  %v2221_v13 = vor.u32 %v2483_v11, %v2220_v10  ;;  %v2477_v28 = vld [vmem:[%s3645_s8 + $0x13c] sm:$0xf]  ;;  %v2460_v10 = vld [vmem:[%s3645_s8 + $0x14] sm:$0xf] }
 0x653   :  { %v793_v15 = vadd.f32 %v785_v14, %v2958_v60  ;;  %v3081_v60 = vsel %vm811_vm6, %v2584_v26, %v810_v29  ;;  %v2481_v14 = vld [vmem:[%s3645_s8 + $0x184] sm:$0xf]  ;;  %1138 = vmatpush.bf16.msra.mxu0 %v2221_v13  ;;  %v2479_v26 = vld [vmem:[%s3645_s8 + $0x158] sm:$0xf0]  ;;  %v2206_v29 = vld [vmem:[%s3645_s8 + $0x15c] sm:$0xf0] }
 0x654   :  { %v2205_v27 = vor.u32 %v2479_v26, %v2204_v25  ;;  %v2134_v13 = vld [vmem:[%s3645_s8 + $0x34] sm:$0xf0] }
 0x655   :  { %800 = vadd.xlane.f32.xlu1 %v793_v15 }
 0x657   :  { %1139 = vmatpush.bf16.msra.mxu0 %v2205_v27 }
 0x658   :  { %v787_v16 = vpop.f32.mrf.mxu3 }
 0x659   :  { %v788_v17 = vadd.f32 %v787_v16, %v724_v9 }
 0x65b   :  { %v794_v20 = vadd.f32 %v788_v17, %v2962_v0  ;;  %v2196_v17 = vld [vmem:[%s3645_s8 + $0x130] sm:$0xf] }
 0x65d   :  { %802 = vadd.xlane.f32.xlu0 %v794_v20 }
 0x660   :  { %v789_v21 = vpop.f32.mrf.mxu3 }
 0x661   :  { %v790_v23 = vadd.f32 %v789_v21, %v724_v9  ;;  %v2214_v9 = vld [vmem:[%s3645_s8 + $0x19c] sm:$0xf0]  ;;  %v2476_v21 = vld [vmem:[%s3645_s8 + $0x134] sm:$0xf] }
 0x663   :  { %v795_v24 = vadd.f32 %v790_v23, %v2964_v1 }
 0x665   :  { %804 = vadd.xlane.f32.xlu0 %v795_v24 }
 0x6c0   :  { %v799_v30 = vpop.xlane.xlu0 %798 }
 0x6c1   :  { %v813_v31 = vmul.f32 %v3081_v60, %v799_v30  ;;  %v2209_v30 = vor.u32 %v2477_v28, %v2206_v29 }
 0x6c3   :  { %v3084_v0 = vsub.f32 %v792_v12, %v813_v31  ;;  %v2217_v12 = vor.u32 %v2480_v7, %v2214_v9  ;;  %v2180_v31 = vld [vmem:[%s3645_s8 + $0xe8] sm:$0xf]  ;;  %v2161_v7 = vor.u32 %v2465_v4, %v2158_v5  ;;  %v2462_v9 = vld [vmem:[%s3645_s8 + $0x30] sm:$0xf0]  ;;  %v797_v5 = vld [vmem:[%s3647_s10 + $0x6] ss:$0 sm:$0xff] }
 0x6c5   :  { %v821_v32 = vmul.f32 %v3084_v0, %v3084_v0  ;;  %1119 = vmatpush.bf16.msrb.mxu2 %v2217_v12  ;;  %v2133_v12 = vor.u32 %v2462_v9, %v2132_v8  ;;  %v2512_v8 = vld [vmem:[%s3646_s9 + $0xa0] sm:$0xff] }
 0x6c7   :  { %825 = vadd.xlane.f32.xlu2 %v821_v32  ;;  %v2474_v32 = vld [vmem:[%s3645_s8 + $0x108] sm:$0xf0] }
 0x6c8   :  { %v801_v1 = vpop.xlane.xlu1 %800 }
 0x6c9   :  { %v814_v33 = vmul.f32 %v3081_v60, %v801_v1  ;;  %v2472_v1 = vld [vmem:[%s3645_s8 + $0xec] sm:$0xf] }
 0x6cb   :  { %v3089_v34 = vsub.f32 %v793_v15, %v814_v33  ;;  %v2222_v15 = vld [vmem:[%s3645_s8 + $0x1a4] sm:$0xf0]  ;;  %v2181_v33 = vor.u32 %v2474_v32, %v2180_v31 }
 0x6cc   :  { %v2225_v16 = vor.u32 %v2481_v14, %v2222_v15  ;;  %v2140_v14 = vld [vmem:[%s3645_s8 + $0x18] sm:$0xf]  ;;  %v2137_v15 = vor.u32 %v2460_v10, %v2134_v13 }
 0x6cd   :  { %v822_v35 = vmul.f32 %v3089_v34, %v3089_v34 }
 0x6ce   :  { %1157 = vmatpush.bf16.msrb.mxu3 %v2225_v16  ;;  %v2463_v16 = vld [vmem:[%s3645_s8 + $0x38] sm:$0xf0] }
 0x6cf   :  { %827 = vadd.xlane.f32.xlu0 %v822_v35  ;;  %v2182_v35 = vld [vmem:[%s3645_s8 + $0x10c] sm:$0xf0] }
 0x6d0   :  { %v803_v36 = vpop.xlane.xlu0 %802 }
 0x6d1   :  { %v815_v37 = vmul.f32 %v3081_v60, %v803_v36  ;;  %v2188_v36 = vld [vmem:[%s3645_s8 + $0xf0] sm:$0xf] }
 0x6d2   :  { %1158 = vmatpush.bf16.msrb.mxu3 %v2209_v30 }
 0x6d3   :  { %v3094_v38 = vsub.f32 %v794_v20, %v815_v37  ;;  %v2478_v20 = vld [vmem:[%s3645_s8 + $0x150] sm:$0xf0] }
 0x6d4   :  { %v2197_v23 = vor.u32 %v2478_v20, %v2196_v17  ;;  %v2475_v37 = vld [vmem:[%s3645_s8 + $0x110] sm:$0xf0]  ;;  %v2461_v17 = vld [vmem:[%s3645_s8 + $0x1c] sm:$0xf]  ;;  %v2142_v20 = vld [vmem:[%s3645_s8 + $0x3c] sm:$0xf0] }
 0x6d5   :  { %v823_v18 = vmul.f32 %v3094_v38, %v3094_v38 }
 0x6d6   :  { %1101 = vmatpush.bf16.msrb.mxu1 %v2197_v23  ;;  %v2145_v23 = vor.u32 %v2461_v17, %v2142_v20 }
 0x6d7   :  { %829 = vadd.xlane.f32.xlu0 %v823_v18  ;;  %v2185_v18 = vor.u32 %v2472_v1, %v2182_v35 }
 0x6d8   :  { %v805_v39 = vpop.xlane.xlu0 %804 }
 0x6d9   :  { %v816_v19 = vmul.f32 %v3081_v60, %v805_v39  ;;  %v2189_v39 = vor.u32 %v2475_v37, %v2188_v36 }
 0x6da   :  { %1102 = vmatpush.bf16.msrb.mxu1 %v2181_v33 }
 0x6db   :  { %v3099_v40 = vsub.f32 %v795_v24, %v816_v19  ;;  %v2198_v24 = vld [vmem:[%s3645_s8 + $0x154] sm:$0xf0]  ;;  %v2473_v19 = vld [vmem:[%s3645_s8 + $0xf4] sm:$0xf]  ;;  %1140 = vmatpush.bf16.msra.mxu0 %v2189_v39 }
 0x6dc   :  { %v2201_v59 = vor.u32 %v2476_v21, %v2198_v24  ;;  %v2141_v21 = vor.u32 %v2463_v16, %v2140_v14 }
 0x6dd   :  { %v824_v41 = vmul.f32 %v3099_v40, %v3099_v40 }
 0x6de   :  { %1120 = vmatpush.bf16.msrb.mxu2 %v2201_v59  ;;  %1103 = vmatpush.bf16.msrb.mxu1 %v2165_v45  ;;  %v2523_v45 = vld [vmem:[%s3646_s9 + $0xf8] sm:$0xff] }
 0x6df   :  { %831 = vadd.xlane.f32.xlu0 %v824_v41  ;;  %v2190_v41 = vld [vmem:[%s3645_s8 + $0x114] sm:$0xf0]  ;;  %1141 = vmatpush.bf16.msra.mxu0 %v2173_v50 }
 0x6e0   :  { %v2193_v42 = vor.u32 %v2473_v19, %v2190_v41 }
 0x6e2   :  { %1121 = vmatpush.bf16.msrb.mxu2 %v2185_v18  ;;  %1159 = vmatpush.bf16.msrb.mxu3 %v2193_v42  ;;  %v2499_v42 = vld [vmem:[%s3646_s9 + $0x38] sm:$0xff]  ;;  %v2502_v18 = vld [vmem:[%s3646_s9 + $0x50] sm:$0xff] }
 0x6e3   :  { %1104 = vmatpush.bf16.msrb.mxu1 %v2149_v57  ;;  %1142 = vmatpush.bf16.msra.mxu0 %v2157_v3  ;;  %v2521_v3 = vld [vmem:[%s3646_s9 + $0xe8] sm:$0xff] }
 0x6e6   :  { %1122 = vmatpush.bf16.msrb.mxu2 %v2169_v49  ;;  %1160 = vmatpush.bf16.msrb.mxu3 %v2177_v53  ;;  %v2522_v53 = vld [vmem:[%s3646_s9 + $0xf0] sm:$0xff] }
 0x6e7   :  { %1105 = vmatpush.bf16.msrb.mxu1 %v2133_v12  ;;  %1143 = vmatpush.bf16.msra.mxu0 %v2141_v21 }
 0x6ea   :  { %1123 = vmatpush.bf16.msrb.mxu2 %v2153_v2  ;;  %1161 = vmatpush.bf16.msrb.mxu3 %v2161_v7  ;;  %v2505_v2 = vld [vmem:[%s3646_s9 + $0x68] sm:$0xff] }
 0x6eb   :  { %1455 = vmatpush.bf16.msra.mxu1 %v2499_v42  ;;  %1493 = vmatpush.bf16.msrb.mxu0 %v2515_v22  ;;  %v2501_v42 = vld [vmem:[%s3646_s9 + $0x48] sm:$0xff] }
 0x6ec   :  { %v2517_v22 = vld [vmem:[%s3646_s9 + $0xc8] sm:$0xff] }
 0x6ee   :  { %1124 = vmatpush.bf16.msrb.mxu2 %v2137_v15  ;;  %1162 = vmatpush.bf16.msrb.mxu3 %v2145_v23 }
 0x6ef   :  { %1456 = vmatpush.bf16.msra.mxu1 %v2498_v47  ;;  %1494 = vmatpush.bf16.msrb.mxu0 %v2514_v48 }
 0x6f2   :  { %1474 = vmatpush.bf16.msra.mxu2 %v2507_v44  ;;  %1512 = vmatpush.bf16.msra.mxu3 %v2523_v45  ;;  %v2516_v44 = vld [vmem:[%s3646_s9 + $0xc0] sm:$0xff] }
 0x6f3   :  { %1457 = vmatpush.bf16.msra.mxu1 %v2497_v58  ;;  %1495 = vmatpush.bf16.msrb.mxu0 %v2513_v61  ;;  %v2129_v45 = vld [vmem:[%s3647_s10 + $0x7] ss:$8 sm:$0xf] }
 0x6f4   :  { %v930_v48 = vperm.slane %v2129_v45, 0 }
 0x6f6   :  { %1475 = vmatpush.bf16.msra.mxu2 %v2506_v52  ;;  %1513 = vmatpush.bf16.msra.mxu3 %v2522_v53 }
 0x6f7   :  { %1496 = vmatpush.bf16.msrb.mxu0 %v2512_v8 }
 0x6fa   :  { %1476 = vmatpush.bf16.msra.mxu2 %v2505_v2  ;;  %1514 = vmatpush.bf16.msra.mxu3 %v2521_v3 }
 0x73a   :  { %v826_v63 = vpop.xlane.xlu2 %825 }
 0x73b   :  { %v833_v6 = vmul.f32 %v826_v63, %v3081_v60 }
 0x73d   :  { %v837_v11 = vadd.f32 1e-05, %v833_v6 }
 0x73f   :  { %2585 = vrsqrt.f32 %v837_v11  ;;  %vm847_vm8 = vweird.f32 %v837_v11 }
 0x742   :  { %v828_v24 = vpop.xlane.xlu0 %827 }
 0x743   :  { %v834_v25 = vmul.f32 %v828_v24, %v3081_v60 }
 0x745   :  { %v2586_v26 = vpop.eup %2585  ;;  %v838_v59 = vadd.f32 1e-05, %v834_v25 }
 0x746   :  { %v842_v27 = vmul.f32 %v2586_v26, %v837_v11  ;;  %vm848_vm7 = vweird.f32 %v2586_v26 }
 0x747   :  { %2587 = vrsqrt.f32 %v838_v59  ;;  %vm3301_vm9 = vmor %vm847_vm8, %vm848_vm7  ;;  %vm857_vm11 = vweird.f32 %v838_v59 }
 0x748   :  { %v843_v28 = vmul.f32 %v2586_v26, %v842_v27 }
 0x74a   :  { %v844_v29 = vmul.f32 0.5, %v843_v28  ;;  %v830_v30 = vpop.xlane.xlu0 %829 }
 0x74b   :  { %v835_v31 = vmul.f32 %v830_v30, %v3081_v60  ;;  %v2504_v30 = vld [vmem:[%s3646_s9 + $0x60] sm:$0xff] }
 0x74c   :  { %v845_v32 = vsub.f32 1.5, %v844_v29  ;;  %1477 = vmatpush.bf16.msra.mxu2 %v2504_v30 }
 0x74d   :  { %v2588_v1 = vpop.eup %2587  ;;  %v3298_v33 = vadd.f32 1e-05, %v835_v31  ;;  %v2520_v31 = vld [vmem:[%s3646_s9 + $0xe0] sm:$0xff] }
 0x74e   :  { %v846_v35 = vmul.f32 %v2586_v26, %v845_v32  ;;  %v852_v36 = vmul.f32 %v2588_v1, %v838_v59  ;;  %vm858_vm10 = vweird.f32 %v2588_v1  ;;  %1515 = vmatpush.bf16.msra.mxu3 %v2520_v31  ;;  %v2494_v32 = vld [vmem:[%s3646_s9 + $0x10] sm:$0xff] }
 0x74f   :  { %2589 = vrsqrt.f32 %v3298_v33  ;;  %vm859_vm12 = vmor %vm857_vm11, %vm858_vm10  ;;  %vm867_vm14 = vweird.f32 %v3298_v33 }
 0x750   :  { %v853_v37 = vmul.f32 %v2588_v1, %v852_v36  ;;  %v850_v39 = vsel %vm3301_vm9, %v2586_v26, %v846_v35  ;;  %v2519_v35 = vld [vmem:[%s3646_s9 + $0xd8] sm:$0xff]  ;;  %v2493_v36 = vld [vmem:[%s3646_s9 + $0x8] sm:$0xff] }
 0x751   :  { %v881_v50 = vmul.f32 %v850_v39, %v3084_v0  ;;  %v2518_v39 = vld [vmem:[%s3646_s9 + $0xd0] sm:$0xff] }
 0x752   :  { %v854_v19 = vmul.f32 0.5, %v853_v37  ;;  %v832_v41 = vpop.xlane.xlu0 %831  ;;  %1516 = vmatpush.bf16.msra.mxu3 %v2519_v35  ;;  %v2509_v37 = vld [vmem:[%s3646_s9 + $0x88] sm:$0xff] }
 0x753   :  { %v836_v43 = vmul.f32 %v832_v41, %v3081_v60  ;;  %v885_v63 = vmul.f32 %v881_v50, %v796_v56  ;;  %v2508_v41 = vld [vmem:[%s3646_s9 + $0x80] sm:$0xff] }
 0x754   :  { %v855_v46 = vsub.f32 1.5, %v854_v19  ;;  %v2492_v19 = vld [vmem:[%s3646_s9] sm:$0xff] }
 0x755   :  { %v2590_v49 = vpop.eup %2589  ;;  %v840_v51 = vadd.f32 1e-05, %v836_v43  ;;  %v3360_v10 = vadd.f32 %v885_v63, %v797_v5  ;;  %v2500_v43 = vld [vmem:[%s3646_s9 + $0x40] sm:$0xff] }
 0x756   :  { %v856_v54 = vmul.f32 %v2588_v1, %v855_v46  ;;  %v862_v55 = vmul.f32 %v2590_v49, %v3298_v33  ;;  %vm868_vm13 = vweird.f32 %v2590_v49  ;;  %v2503_v33 = vld [vmem:[%s3646_s9 + $0x58] sm:$0xff]  ;;  %1517 = vmatpush.bf16.msra.mxu3 %v2518_v39 }
 0x757   :  { %2591 = vrsqrt.f32 %v840_v51  ;;  %vm869_vm15 = vmor %vm867_vm14, %vm868_vm13  ;;  %vm877_vm4 = vweird.f32 %v840_v51  ;;  %1478 = vmatpush.bf16.msra.mxu2 %v2503_v33 }
 0x758   :  { %v860_v0 = vsel %vm859_vm12, %v2588_v1, %v856_v54  ;;  %v863_v57 = vmul.f32 %v2590_v49, %v862_v55  ;;  %v2510_v1 = vld [vmem:[%s3646_s9 + $0x90] sm:$0xff]  ;;  %v931_v55 = vperm.slane %v2129_v45, 1 }
 0x759   :  { %v882_v62 = vmul.f32 %v860_v0, %v3089_v34  ;;  %v2496_v34 = vld [vmem:[%s3646_s9 + $0x20] sm:$0xff] }
 0x75a   :  { %v864_v4 = vmul.f32 0.5, %v863_v57  ;;  %1458 = vmatpush.bf16.msra.mxu1 %v2496_v34  ;;  %1518 = vmatpush.bf16.msra.mxu3 %v2517_v22  ;;  %v933_v57 = vperm.slane %v2129_v45, 3 }
 0x75b   :  { %v886_v6 = vmul.f32 %v882_v62, %v796_v56  ;;  %1479 = vmatpush.bf16.msra.mxu2 %v2502_v18 }
 0x75c   :  { %v865_v7 = vsub.f32 1.5, %v864_v4 }
 0x75d   :  { %v2592_v9 = vpop.eup %2591  ;;  %v3362_v11 = vadd.f32 %v886_v6, %v797_v5 }
 0x75e   :  { %v866_v12 = vmul.f32 %v2590_v49, %v865_v7  ;;  %v872_v13 = vmul.f32 %v2592_v9, %v840_v51  ;;  %vm878_vm0 = vweird.f32 %v2592_v9  ;;  %1519 = vmatpush.bf16.msra.mxu3 %v2516_v44 }
 0x75f   :  { %v893_v14 = vpack.c.bf16 %v3362_v11, %v3360_v10  ;;  %vm879_vm5 = vmor %vm877_vm4, %vm878_vm0  ;;  %1480 = vmatpush.bf16.msra.mxu2 %v2501_v42 }
 0x760   :  { %v873_v15 = vmul.f32 %v2592_v9, %v872_v13  ;;  %v870_v16 = vsel %vm869_vm15, %v2590_v49, %v866_v12  ;;  %v932_v49 = vperm.slane %v2129_v45, 2 }
 0x761   :  { %1106 = vmatmul.bf16.vlgmr.msrb.gmra.mxu1 %v893_v14  ;;  %1125 = vmatmul.bf16.vlgmr.msrb.gmra.mxu2 %v893_v14  ;;  %v883_v21 = vmul.f32 %v870_v16, %v3094_v38  ;;  %v2495_v38 = vld [vmem:[%s3646_s9 + $0x18] sm:$0xff] }
 0x762   :  { %v874_v17 = vmul.f32 0.5, %v873_v15  ;;  %1144 = vmatmul.bf16.vlgmr.msra.gmra.mxu0 %v893_v14  ;;  %1163 = vmatmul.bf16.vlgmr.msrb.gmra.mxu3 %v893_v14 }
 0x763   :  { %v887_v26 = vmul.f32 %v883_v21, %v796_v56  ;;  %1459 = vmatpush.bf16.msra.mxu1 %v2495_v38  ;;  %1481 = vmatpush.bf16.msra.mxu2 %v2500_v43 }
 0x764   :  { %v875_v20 = vsub.f32 1.5, %v874_v17 }
 0x765   :  { %v3369_v27 = vadd.f32 %v887_v26, %v797_v5 }
 0x766   :  { %v876_v23 = vmul.f32 %v2592_v9, %v875_v20 }
 0x767   :  { %1460 = vmatpush.bf16.msra.mxu1 %v2494_v32 }
 0x768   :  { %v880_v24 = vsel %vm879_vm5, %v2592_v9, %v876_v23 }
 0x769   :  { %v884_v25 = vmul.f32 %v880_v24, %v3099_v40  ;;  %v2511_v40 = vld [vmem:[%s3646_s9 + $0x98] sm:$0xff] }
 0x76a   :  { %1497 = vmatpush.bf16.msrb.mxu0 %v2511_v40 }
 0x76b   :  { %v888_v59 = vmul.f32 %v884_v25, %v796_v56  ;;  %1461 = vmatpush.bf16.msra.mxu1 %v2493_v36 }
 0x76d   :  { %v3371_v28 = vadd.f32 %v888_v59, %v797_v5 }
 0x76e   :  { %1498 = vmatpush.bf16.msrb.mxu0 %v2510_v1 }
 0x76f   :  { %v894_v29 = vpack.c.bf16 %v3371_v28, %v3369_v27  ;;  %1462 = vmatpush.bf16.msra.mxu1 %v2492_v19 }
 0x771   :  { %1111 = vmatmul.bf16.gmra.mxu1 %v894_v29  ;;  %1130 = vmatmul.bf16.gmra.mxu2 %v894_v29 }
 0x772   :  { %1149 = vmatmul.bf16.gmra.mxu0 %v894_v29  ;;  %1168 = vmatmul.bf16.gmra.mxu3 %v894_v29 }
 0x773   :  { %1499 = vmatpush.bf16.msrb.mxu0 %v2509_v37 }
 0x777   :  { %1500 = vmatpush.bf16.msrb.mxu0 %v2508_v41 }
 0x7de   :  { %v1107_v46 = vpop.f32.mrf.mxu1 }
 0x7df   :  { %v1145_v47 = vpop.f32.mrf.mxu0  ;;  %v1108_v51 = vadd.f32 %v1107_v46, %v930_v48 }
 0x7e0   :  { %v1146_v53 = vadd.f32 %v1145_v47, %v932_v49 }
 0x7e1   :  { %v1174_v61 = vmax.f32 %v1108_v51, 0.0 }
 0x7e2   :  { %v1176_v63 = vmax.f32 %v1146_v53, 0.0 }
 0x7e4   :  { %v1126_v50 = vpop.f32.mrf.mxu2 }
 0x7e5   :  { %v1164_v52 = vpop.f32.mrf.mxu3  ;;  %v1127_v3 = vadd.f32 %v1126_v50, %v931_v55 }
 0x7e6   :  { %v1109_v54 = vpop.f32.mrf.mxu1  ;;  %v1165_v5 = vadd.f32 %v1164_v52, %v933_v57 }
 0x7e7   :  { %v1110_v56 = vadd.f32 %v1109_v54, %v930_v48  ;;  %v1147_v0 = vpop.f32.mrf.mxu0  ;;  %v1175_v13 = vmax.f32 %v1127_v3, 0.0 }
 0x7e8   :  { %v1148_v58 = vadd.f32 %v1147_v0, %v932_v49  ;;  %v1177_v16 = vmax.f32 %v1165_v5, 0.0 }
 0x7e9   :  { %v1178_v62 = vmax.f32 %v1110_v56, 0.0 }
 0x7ea   :  { %v1180_v2 = vmax.f32 %v1148_v58, 0.0 }
 0x7eb   :  { %v1190_v4 = vpack.c.bf16 %v1178_v62, %v1174_v61 }
 0x7ec   :  { %v1192_v6 = vpack.c.bf16 %v1180_v2, %v1176_v63  ;;  %v1128_v7 = vpop.f32.mrf.mxu2 }
 0x7ed   :  { %v1129_v34 = vadd.f32 %v1128_v7, %v931_v55  ;;  %v1166_v8 = vpop.f32.mrf.mxu3  ;;  %1463 = vmatmul.bf16.vlgmr.msra.gmra.mxu1 %v1190_v4 }
 0x7ee   :  { %v1167_v9 = vadd.f32 %v1166_v8, %v933_v57  ;;  %1501 = vmatmul.bf16.vlgmr.msrb.gmra.mxu0 %v1192_v6  ;;  %v1112_v12 = vpop.f32.mrf.mxu1 }
 0x7ef   :  { %v1179_v14 = vmax.f32 %v1129_v34, 0.0  ;;  %v1150_v15 = vpop.f32.mrf.mxu0  ;;  %v1113_v24 = vadd.f32 %v1112_v12, %v930_v48 }
 0x7f0   :  { %v1181_v17 = vmax.f32 %v1167_v9, 0.0  ;;  %v1151_v26 = vadd.f32 %v1150_v15, %v932_v49 }
 0x7f1   :  { %v1191_v20 = vpack.c.bf16 %v1179_v14, %v1175_v13  ;;  %v1182_v30 = vmax.f32 %v1113_v24, 0.0 }
 0x7f2   :  { %v1193_v21 = vpack.c.bf16 %v1181_v17, %v1177_v16  ;;  %v1184_v32 = vmax.f32 %v1151_v26, 0.0 }
 0x7f3   :  { %1482 = vmatmul.bf16.vlgmr.msra.gmra.mxu2 %v1191_v20 }
 0x7f4   :  { %1520 = vmatmul.bf16.vlgmr.msra.gmra.mxu3 %v1193_v21  ;;  %v1131_v23 = vpop.f32.mrf.mxu2 }
 0x7f5   :  { %v1169_v25 = vpop.f32.mrf.mxu3  ;;  %v1132_v33 = vadd.f32 %v1131_v23, %v931_v55 }
 0x7f6   :  { %v1114_v59 = vpop.f32.mrf.mxu1  ;;  %v1170_v36 = vadd.f32 %v1169_v25, %v933_v57 }
 0x7f7   :  { %v1115_v29 = vadd.f32 %v1114_v59, %v930_v48  ;;  %v1152_v38 = vpop.f32.mrf.mxu0  ;;  %v1183_v42 = vmax.f32 %v1132_v33, 0.0  ;;  %v1262_v48 = vld [vmem:[%s3647_s10 + $0x20] ss:$0 sm:$0xff] }
 0x7f8   :  { %v1153_v40 = vadd.f32 %v1152_v38, %v932_v49  ;;  %v1185_v43 = vmax.f32 %v1170_v36, 0.0 }
 0x7f9   :  { %v1186_v31 = vmax.f32 %v1115_v29, 0.0 }
 0x7fa   :  { %v1188_v1 = vmax.f32 %v1153_v40, 0.0 }
 0x7fb   :  { %v1194_v35 = vpack.c.bf16 %v1186_v31, %v1182_v30 }
 0x7fc   :  { %v1133_v37 = vpop.f32.mrf.mxu2  ;;  %v1196_v18 = vpack.c.bf16 %v1188_v1, %v1184_v32 }
 0x7fd   :  { %v1134_v39 = vadd.f32 %v1133_v37, %v931_v55  ;;  %v1171_v19 = vpop.f32.mrf.mxu3  ;;  %1468 = vmatmul.bf16.gmra.mxu1 %v1194_v35 }
 0x7fe   :  { %v1172_v41 = vadd.f32 %v1171_v19, %v933_v57  ;;  %1506 = vmatmul.bf16.gmra.mxu0 %v1196_v18  ;;  %v2416_v18 = vld [vmem:[%s3645_s8 + $0x218] sm:$0xf] }
 0x7ff   :  { %v1187_v22 = vmax.f32 %v1134_v39, 0.0  ;;  %v2531_v39 = vld [vmem:[%s3645_s8 + $0x238] sm:$0xf0] }
 0x800   :  { %v1189_v44 = vmax.f32 %v1172_v41, 0.0  ;;  %v2417_v19 = vor.u32 %v2531_v39, %v2416_v18  ;;  %v2412_v41 = vld [vmem:[%s3645_s8 + $0x1d0] sm:$0xf] }
 0x801   :  { %v1195_v45 = vpack.c.bf16 %v1187_v22, %v1183_v42  ;;  %v2530_v42 = vld [vmem:[%s3645_s8 + $0x1f0] sm:$0xf0] }
 0x802   :  { %v1197_v46 = vpack.c.bf16 %v1189_v44, %v1185_v43  ;;  %1692 = vmatpush.bf16.msrb.mxu1 %v2417_v19  ;;  %v2413_v22 = vor.u32 %v2530_v42, %v2412_v41  ;;  %v2408_v43 = vld [vmem:[%s3645_s8 + $0x188] sm:$0xf]  ;;  %v2529_v44 = vld [vmem:[%s3645_s8 + $0x1a8] sm:$0xf0] }
 0x803   :  { %1487 = vmatmul.bf16.gmra.mxu2 %v1195_v45  ;;  %v2409_v45 = vor.u32 %v2529_v44, %v2408_v43 }
 0x804   :  { %1525 = vmatmul.bf16.gmra.mxu3 %v1197_v46  ;;  %v2404_v46 = vld [vmem:[%s3645_s8 + $0x140] sm:$0xf] }
 0x806   :  { %1693 = vmatpush.bf16.msrb.mxu1 %v2413_v22 }
 0x80a   :  { %1694 = vmatpush.bf16.msrb.mxu1 %v2409_v45 }
 0x86a   :  { %v1464_v47 = vpop.f32.mrf.mxu1 }
 0x86b   :  { %v1502_v49 = vpop.f32.mrf.mxu0  ;;  %v1465_v50 = vadd.f32 %v1464_v47, %v1262_v48  ;;  %v2528_v47 = vld [vmem:[%s3645_s8 + $0x160] sm:$0xf0] }
 0x872   :  { %v1466_v51 = vpop.f32.mrf.mxu1 }
 0x873   :  { %v1504_v0 = vpop.f32.mrf.mxu0  ;;  %v1467_v57 = vadd.f32 %v1466_v51, %v1262_v48 }
 0x876   :  { %v1483_v52 = vpop.f32.mrf.mxu2 }
 0x877   :  { %v1484_v53 = vadd.f32 %v1483_v52, %v1465_v50  ;;  %v1521_v54 = vpop.f32.mrf.mxu3  ;;  %v2527_v50 = vld [vmem:[%s3645_s8 + $0x118] sm:$0xf0]  ;;  %v2396_v52 = vld [vmem:[%s3645_s8 + $0xb0] sm:$0xf] }
 0x879   :  { %v1503_v55 = vadd.f32 %v1502_v49, %v1484_v53  ;;  %v2400_v49 = vld [vmem:[%s3645_s8 + $0xf8] sm:$0xf]  ;;  %v2526_v53 = vld [vmem:[%s3645_s8 + $0xd0] sm:$0xf0] }
 0x87a   :  { %v1469_v2 = vpop.f32.mrf.mxu1  ;;  %v2401_v51 = vor.u32 %v2527_v50, %v2400_v49 }
 0x87b   :  { %v1522_v56 = vadd.f32 %v1521_v54, %v1503_v55  ;;  %v1470_v5 = vadd.f32 %v1469_v2, %v1262_v48  ;;  %v1507_v7 = vpop.f32.mrf.mxu0  ;;  %v2397_v54 = vor.u32 %v2526_v53, %v2396_v52  ;;  %v2392_v55 = vld [vmem:[%s3645_s8 + $0x68] sm:$0xf] }
 0x87d   :  { %v1531_v58 = vadd.f32 %v1522_v56, %v3360_v10  ;;  %v2525_v56 = vld [vmem:[%s3645_s8 + $0x88] sm:$0xf0] }
 0x87e   :  { %v1485_v61 = vpop.f32.mrf.mxu2 }
 0x87f   :  { %v1486_v62 = vadd.f32 %v1485_v61, %v1467_v57  ;;  %v1523_v63 = vpop.f32.mrf.mxu3  ;;  %1537 = vadd.xlane.f32.xlu1 %v1531_v58  ;;  %v2388_v61 = vld [vmem:[%s3645_s8 + $0x20] sm:$0xf] }
 0x881   :  { %v1505_v3 = vadd.f32 %v1504_v0, %v1486_v62  ;;  %v2393_v0 = vor.u32 %v2525_v56, %v2392_v55  ;;  %v2524_v62 = vld [vmem:[%s3645_s8 + $0x40] sm:$0xf0] }
 0x882   :  { %v1471_v13 = vpop.f32.mrf.mxu1  ;;  %v2389_v2 = vor.u32 %v2524_v62, %v2388_v61 }
 0x883   :  { %v1524_v4 = vadd.f32 %v1523_v63, %v1505_v3  ;;  %v1472_v15 = vadd.f32 %v1471_v13, %v1262_v48  ;;  %v1509_v20 = vpop.f32.mrf.mxu0  ;;  %v2405_v48 = vor.u32 %v2528_v47, %v2404_v46 }
 0x885   :  { %v1532_v6 = vadd.f32 %v1524_v4, %v3362_v11  ;;  %1695 = vmatpush.bf16.msrb.mxu1 %v2405_v48 }
 0x886   :  { %v1488_v34 = vpop.f32.mrf.mxu2 }
 0x887   :  { %v1489_v8 = vadd.f32 %v1488_v34, %v1470_v5  ;;  %1539 = vadd.xlane.f32.xlu0 %v1532_v6  ;;  %v1526_v9 = vpop.f32.mrf.mxu3 }
 0x889   :  { %v1508_v12 = vadd.f32 %v1507_v7, %v1489_v8  ;;  %1696 = vmatpush.bf16.msrb.mxu1 %v2401_v51 }
 0x88b   :  { %v1527_v14 = vadd.f32 %v1526_v9, %v1508_v12 }
 0x88d   :  { %v1533_v10 = vadd.f32 %v1527_v14, %v3369_v27  ;;  %1697 = vmatpush.bf16.msrb.mxu1 %v2397_v54 }
 0x88e   :  { %v1490_v16 = vpop.f32.mrf.mxu2 }
 0x88f   :  { %v1491_v17 = vadd.f32 %v1490_v16, %v1472_v15  ;;  %1541 = vadd.xlane.f32.xlu1 %v1533_v10  ;;  %v1528_v23 = vpop.f32.mrf.mxu3 }
 0x891   :  { %v1510_v21 = vadd.f32 %v1509_v20, %v1491_v17  ;;  %1698 = vmatpush.bf16.msrb.mxu1 %v2393_v0 }
 0x893   :  { %v1529_v24 = vadd.f32 %v1528_v23, %v1510_v21 }
 0x895   :  { %v1534_v11 = vadd.f32 %v1529_v24, %v3371_v28  ;;  %1699 = vmatpush.bf16.msrb.mxu1 %v2389_v2 }
 0x897   :  { %1543 = vadd.xlane.f32.xlu0 %v1534_v11 }
 0x8f2   :  { %v1538_v25 = vpop.xlane.xlu1 %1537 }
 0x8f3   :  { %v1545_v26 = vmul.f32 %v1538_v25, %v3081_v60 }
 0x8f5   :  { %v3440_v59 = vsub.f32 %v1531_v58, %v1545_v26 }
 0x8f7   :  { %v1553_v29 = vmul.f32 %v3440_v59, %v3440_v59 }
 0x8f9   :  { %1557 = vadd.xlane.f32.xlu1 %v1553_v29 }
 0x8fa   :  { %v1540_v27 = vpop.xlane.xlu0 %1539 }
 0x8fb   :  { %v1546_v38 = vmul.f32 %v1540_v27, %v3081_v60 }
 0x8fd   :  { %v3445_v40 = vsub.f32 %v1532_v6, %v1546_v38 }
 0x8ff   :  { %v1554_v30 = vmul.f32 %v3445_v40, %v3445_v40 }
 0x901   :  { %1559 = vadd.xlane.f32.xlu0 %v1554_v30  ;;  %v1535_v30 = vld [vmem:[%s3647_s10 + $0x21] ss:$0 sm:$0xff] }
 0x902   :  { %v1542_v28 = vpop.xlane.xlu1 %1541 }
 0x903   :  { %v1547_v31 = vmul.f32 %v1542_v28, %v3081_v60 }
 0x905   :  { %v3450_v32 = vsub.f32 %v1533_v10, %v1547_v31 }
 0x907   :  { %v1555_v1 = vmul.f32 %v3450_v32, %v3450_v32 }
 0x909   :  { %1561 = vadd.xlane.f32.xlu2 %v1555_v1 }
 0x90a   :  { %v1544_v33 = vpop.xlane.xlu0 %1543 }
 0x90b   :  { %v1548_v35 = vmul.f32 %v1544_v33, %v3081_v60 }
 0x90d   :  { %v3455_v36 = vsub.f32 %v1534_v11, %v1548_v35 }
 0x90f   :  { %v1556_v37 = vmul.f32 %v3455_v36, %v3455_v36 }
 0x911   :  { %1563 = vadd.xlane.f32.xlu1 %v1556_v37 }
 0x96c   :  { %v1558_v57 = vpop.xlane.xlu1 %1557 }
 0x96d   :  { %v1565_v58 = vmul.f32 %v1558_v57, %v3081_v60  ;;  %v1643_v57 = vld [vmem:[%s3647_s10 + $0x23] ss:$0 sm:$0xff] }
 0x96f   :  { %v1569_v63 = vadd.f32 1e-05, %v1565_v58 }
 0x971   :  { %2593 = vrsqrt.f32 %v1569_v63  ;;  %vm1579_vm7 = vweird.f32 %v1569_v63 }
 0x974   :  { %v1560_v3 = vpop.xlane.xlu0 %1559 }
 0x975   :  { %v1566_v4 = vmul.f32 %v1560_v3, %v3081_v60 }
 0x977   :  { %v2594_v5 = vpop.eup %2593  ;;  %v1570_v6 = vadd.f32 1e-05, %v1566_v4 }
 0x978   :  { %v1574_v7 = vmul.f32 %v2594_v5, %v1569_v63  ;;  %vm1580_vm6 = vweird.f32 %v2594_v5 }
 0x979   :  { %2595 = vrsqrt.f32 %v1570_v6  ;;  %vm1581_vm8 = vmor %vm1579_vm7, %vm1580_vm6  ;;  %vm1589_vm10 = vweird.f32 %v1570_v6 }
 0x97a   :  { %v1575_v34 = vmul.f32 %v2594_v5, %v1574_v7  ;;  %v1711_v7 = vld [vmem:[%s3642_s5] sm:$0xf]  ;;  %s3545_s5 = sld [smem:[#allocation2 + $0x1]] }
 0x97c   :  { %v1576_v8 = vmul.f32 0.5, %v1575_v34  ;;  %v1562_v9 = vpop.xlane.xlu2 %1561 }
 0x97d   :  { %v1567_v12 = vmul.f32 %v1562_v9, %v3081_v60 }
 0x97e   :  { %v1577_v13 = vsub.f32 1.5, %v1576_v8 }
 0x97f   :  { %v2596_v14 = vpop.eup %2595  ;;  %v1571_v15 = vadd.f32 1e-05, %v1567_v12 }
 0x980   :  { %v1578_v10 = vmul.f32 %v2594_v5, %v1577_v13  ;;  %v1584_v16 = vmul.f32 %v2596_v14, %v1570_v6  ;;  %vm1590_vm9 = vweird.f32 %v2596_v14 }
 0x981   :  { %2597 = vrsqrt.f32 %v1571_v15  ;;  %vm1591_vm11 = vmor %vm1589_vm10, %vm1590_vm9  ;;  %vm1599_vm13 = vweird.f32 %v1571_v15 }
 0x982   :  { %v1585_v17 = vmul.f32 %v2596_v14, %v1584_v16  ;;  %v1582_v20 = vsel %vm1581_vm8, %v2594_v5, %v1578_v10 }
 0x983   :  { %v1613_v26 = vmul.f32 %v1582_v20, %v3440_v59  ;;  %v1536_v59 = vld [vmem:[%s3647_s10 + $0x22] ss:$0 sm:$0xff] }
 0x984   :  { %v1586_v21 = vmul.f32 0.5, %v1585_v17  ;;  %v1564_v23 = vpop.xlane.xlu1 %1563 }
 0x985   :  { %v1568_v24 = vmul.f32 %v1564_v23, %v3081_v60  ;;  %v1617_v60 = vmul.f32 %v1613_v26, %v1535_v30 }
 0x986   :  { %v1587_v11 = vsub.f32 1.5, %v1586_v21 }
 0x987   :  { %v2598_v25 = vpop.eup %2597  ;;  %v1572_v29 = vadd.f32 1e-05, %v1568_v24  ;;  %v1621_v39 = vadd.f32 %v1617_v60, %v1536_v59 }
 0x988   :  { %v1588_v27 = vmul.f32 %v2596_v14, %v1587_v11  ;;  %v1594_v38 = vmul.f32 %v2598_v25, %v1571_v15  ;;  %vm1600_vm12 = vweird.f32 %v2598_v25 }
 0x989   :  { %2599 = vrsqrt.f32 %v1572_v29  ;;  %vm1601_vm14 = vmor %vm1599_vm13, %vm1600_vm12  ;;  %vm1609_vm0 = vweird.f32 %v1572_v29 }
 0x98a   :  { %v1592_v28 = vsel %vm1591_vm11, %v2596_v14, %v1588_v27  ;;  %v1595_v31 = vmul.f32 %v2598_v25, %v1594_v38  ;;  %v2621_v27 = vld [vmem:[%s3637_s0 + $0x8] sm:$0xff] }
 0x98b   :  { %v1614_v1 = vmul.f32 %v1592_v28, %v3445_v40  ;;  %v1820_v38 = vmul.f32 %v2621_v27, %v2621_v27 }
 0x98c   :  { %v1596_v33 = vmul.f32 0.5, %v1595_v31 }
 0x98d   :  { %v1618_v35 = vmul.f32 %v1614_v1, %v1535_v30  ;;  %v1826_v1 = vsel %vm202_vm3, %v1820_v38, 0.0 }
 0x98e   :  { %v1597_v37 = vsub.f32 1.5, %v1596_v33  ;;  %1827 = vadd.xlane.f32.xlu1 %v1826_v1  ;;  %v1750_v33 = vstv %s3545_s5 }
 0x98f   :  { %v2600_v18 = vpop.eup %2599  ;;  %v1622_v19 = vadd.f32 %v1618_v35, %v1536_v59 }
 0x990   :  { %v1598_v41 = vmul.f32 %v2598_v25, %v1597_v37  ;;  %v1604_v42 = vmul.f32 %v2600_v18, %v1572_v29  ;;  %vm1610_vm15 = vweird.f32 %v2600_v18 }
 0x991   :  { %v1625_v22 = vpack.c.bf16 %v1622_v19, %v1621_v39  ;;  %vm1611_vm4 = vmor %vm1609_vm0, %vm1610_vm15 }
 0x992   :  { %v1605_v43 = vmul.f32 %v2600_v18, %v1604_v42  ;;  %v1602_v44 = vsel %vm1601_vm14, %v2598_v25, %v1598_v41  ;;  %v2622_v41 = vld [vmem:[%s3641_s4] sm:$0xff]  ;;  %v2623_v42 = vld [vmem:[%s3641_s4 + $0x8] sm:$0xff]  ;;  %s1789_s4 = ssub.f32 1.0, %s3545_s5 }
 0x993   :  { %1700 = vmatmul.bf16.vlgmr.msrb.gmra.mxu1 %v1625_v22  ;;  %v1615_v46 = vmul.f32 %v1602_v44, %v3450_v32  ;;  %v2624_v22 = vld [vmem:[%s3637_s0] sm:$0xff]  ;;  %v2625_v44 = vld [vmem:[%s3637_s0 + $0x10] sm:$0xff] }
 0x994   :  { %v1606_v40 = vmul.f32 0.5, %v1605_v43  ;;  %v1819_v43 = vmul.f32 %v2624_v22, %v2624_v22 }
 0x995   :  { %v1619_v50 = vmul.f32 %v1615_v46, %v1535_v30  ;;  %v2626_v46 = vld [vmem:[%s3637_s0 + $0x18] sm:$0xff]  ;;  %s2671_s0 = smov [#allocation5]  }
 0x996   :  { %v1607_v45 = vsub.f32 1.5, %v1606_v40  ;;  %v1823_v40 = vsel %vm202_vm3, %v1819_v43, 0.0  ;;  %s1943_s11 = sshll.u32 %s2671_s0, 4  ;;  %s1944_s11 = int_to_ptr.vmem [resolvable:$true] %s1943_s11 }
 0x997   :  { %v1623_v52 = vadd.f32 %v1619_v50, %v1536_v59  ;;  %1824 = vadd.xlane.f32.xlu2 %v1823_v40  ;;  %v1790_v50 = vstv %s1789_s4 }
 0x998   :  { %v1608_v47 = vmul.f32 %v2600_v18, %v1607_v45  ;;  %v1821_v45 = vmul.f32 %v2625_v44, %v2625_v44 }
 0x99a   :  { %v1612_v48 = vsel %vm1611_vm4, %v2600_v18, %v1608_v47  ;;  %v1822_v47 = vmul.f32 %v2626_v46, %v2626_v46 }
 0x99b   :  { %v1616_v49 = vmul.f32 %v1612_v48, %v3455_v36  ;;  %v1829_v48 = vsel %vm202_vm3, %v1821_v45, 0.0 }
 0x99d   :  { %v1620_v51 = vmul.f32 %v1616_v49, %v1535_v30  ;;  %v1832_v49 = vsel %vm202_vm3, %v1822_v47, 0.0 }
 0x99f   :  { %v1624_v53 = vadd.f32 %v1620_v51, %v1536_v59  ;;  %1833 = vadd.xlane.f32.xlu2 %v1832_v49  ;;  %v1791_v51 = vmul.f32 %v2624_v22, %v1790_v50 }
 0x9a1   :  { %v1626_v54 = vpack.c.bf16 %v1624_v53, %v1623_v52 }
 0x9a3   :  { %1705 = vmatmul.bf16.gmra.mxu1 %v1626_v54 }
 0xa10   :  { %v1701_v55 = vpop.f32.mrf.mxu1 }
 0xa11   :  { %v3530_v36 = vadd.f32 %v1701_v55, %v1643_v57 }
 0xa13   :  { %v1712_v5 = vmul.f32 %v3530_v36, %v3530_v36 }
 0xa18   :  { %v1703_v56 = vpop.f32.mrf.mxu1 }
 0xa19   :  { %v3526_v61 = vadd.f32 %v1703_v56, %v1643_v57 }
 0xa1b   :  { %v1713_v3 = vmul.f32 %v3526_v61, %v3526_v61 }
 0xa1d   :  { %v1716_v6 = vpack.c.bf16 %v1713_v3, %v1712_v5 }
 0xa20   :  { %v1706_v0 = vpop.f32.mrf.mxu1 }
 0xa21   :  { %v3524_v32 = vadd.f32 %v1706_v0, %v1643_v57  ;;  %v1792_v0 = vmul.f32 %v2621_v27, %v1790_v50 }
 0xa23   :  { %v1714_v63 = vmul.f32 %v3524_v32, %v3524_v32 }
 0xa28   :  { %v1708_v58 = vpop.f32.mrf.mxu1 }
 0xa29   :  { %v3528_v62 = vadd.f32 %v1708_v58, %v1643_v57 }
 0xa2b   :  { %v1715_v2 = vmul.f32 %v3528_v62, %v3528_v62 }
 0xa2d   :  { %v1717_v4 = vpack.c.bf16 %v1715_v2, %v1714_v63 }
 0xa2f   :  { %1727 = vmatpush.bf16.msrb.mxu2 %v1717_v4 }
 0xa33   :  { %1728 = vmatpush.bf16.msrb.mxu2 %v1716_v6 }
 0xa36   :  { %2418 = vmatmul.msk.bf16.vlgmr.msrb.gmra.mxu2 %vm202_vm3, %v1711_v7 }
 0xab9   :  { %v1730_v34 = vpop.f32.mrf.mxu2 }
 0xaba   :  { %v1734_v8 = vsel %vm202_vm3, %v1730_v34, 0.0 }
 0xabb   :  { %1735 = vadd.xlane.f32.xlu0 %v1734_v8 }
 0xac1   :  { %v1732_v9 = vpop.f32.mrf.mxu2 }
 0xac3   :  { %1830 = vadd.xlane.f32.xlu0 %v1829_v48 }
 0xb2e   :  { %v1736_v12 = vpop.xlane.xlu0 %1735 }
 0xb2f   :  { %2601 = vrsqrt.f32 %v1736_v12  ;;  %vm1744_vm5 = vcmp.eq.f32.partialorder %v1736_v12, inf  ;;  %v1747_v21 = vand.u32 2147483648, %v1736_v12  ;;  %vm1746_vm6 = vcmp.eq.f32.partialorder %v1736_v12, 0.0 }
 0xb35   :  { %v2602_v13 = vpop.eup %2601 }
 0xb36   :  { %v1738_v14 = vmul.f32 %v2602_v13, %v1736_v12 }
 0xb38   :  { %v1739_v15 = vmul.f32 %v2602_v13, %v1738_v14 }
 0xb3a   :  { %v1740_v10 = vmul.f32 0.5, %v1739_v15  ;;  %v3598_v15 = vpop.xlane.xlu1 %1827 }
 0xb3b   :  { %vm1854_vm14 = vcmp.eq.f32.partialorder %v3598_v15, inf  ;;  %vm1856_vm0 = vcmp.eq.f32.partialorder %v3598_v15, 0.0 }
 0xb3c   :  { %v1741_v16 = vsub.f32 1.5, %v1740_v10 }
 0xb3e   :  { %v1742_v17 = vmul.f32 %v2602_v13, %v1741_v16 }
 0xb40   :  { %v1743_v20 = vmul.f32 %v1742_v17, %v1736_v12 }
 0xb42   :  { %v1745_v23 = vsel %vm1744_vm5, %v1736_v12, %v1743_v20 }
 0xb43   :  { %v1748_v24 = vsel %vm1746_vm6, %v1747_v21, %v1745_v23  ;;  %v3601_v21 = vpop.xlane.xlu0 %1830 }
 0xb44   :  { %v1749_v11 = vmax.f32 %v1748_v24, 1e-05  ;;  %vm1866_vm6 = vcmp.eq.f32.partialorder %v3601_v21, inf }
 0xb46   :  { %2603 = vrcp.f32 %v1749_v11  ;;  %v1762_v30 = vand.u32 2147483648, %v1749_v11  ;;  %v1760_v31 = vand.u32 2147483647, %v1749_v11  ;;  %vm1756_vm8 = vweird.f32 %v1749_v11 }
 0xb48   :  { %v1763_v59 = vor.u32 1.1754944e-38, %v1762_v30  ;;  %vm1761_vm10 = vcmp.eq.f32.partialorder %v1760_v31, 8.507059e+37 }
 0xb4c   :  { %v2604_v25 = vpop.eup %2603 }
 0xb4d   :  { %v1752_v26 = vmul.f32 %v2604_v25, %v1749_v11  ;;  %vm1757_vm7 = vweird.f32 %v2604_v25 }
 0xb4e   :  { %vm1758_vm9 = vmor %vm1756_vm8, %vm1757_vm7  ;;  %vm1868_vm8 = vcmp.eq.f32.partialorder %v3601_v21, 0.0 }
 0xb4f   :  { %v1753_v29 = vsub.f32 1.0, %v1752_v26 }
 0xb51   :  { %v1754_v28 = vmul.f32 %v2604_v25, %v1753_v29 }
 0xb53   :  { %v1755_v60 = vadd.f32 %v2604_v25, %v1754_v28 }
 0xb55   :  { %v1759_v35 = vsel %vm1758_vm9, %v2604_v25, %v1755_v60 }
 0xb56   :  { %v1764_v37 = vsel %vm1761_vm10, %v1763_v59, %v1759_v35 }
 0xb57   :  { %v1765_v18 = vmul.f32 %v1764_v37, %v1750_v33 }
 0xb59   :  { %v1766_v39 = vpack.c.bf16 %v1765_v18, %v1765_v18 }
 0xb5b   :  { %v1768_v19 = vsel %vm131_vm1, %v1766_v39, 0 }
 0xb5c   :  { %1777 = vmatpush.bf16.msra.mxu0 %v1768_v19 }
 0xb5f   :  { %2419 = vmatmul.msk.bf16.vlgmr.msra.gmra.mxu0 %vm124_vm2, %v2622_v41 }
 0xb6f   :  { %2420 = vmatmul.msk.bf16.gmra.mxu0 %vm124_vm2, %v2623_v42 }
 0xbdc   :  { %v1779_v52 = vpop.f32.mrf.mxu0 }
 0xbdd   :  { %v1795_v53 = vmul.f32 %v1779_v52, %v3530_v36  ;;  %v1793_v36 = vmul.f32 %v2625_v44, %v1790_v50 }
 0xbdf   :  { %v3575_v54 = vadd.f32 %v1795_v53, %v1791_v51 }
 0xbe1   :  { %v1803_v55 = vmul.f32 %v3575_v54, %v3575_v54 }
 0xbe3   :  { %v1807_v56 = vsel %vm202_vm3, %v1803_v55, 0.0 }
 0xbe4   :  { %1808 = vadd.xlane.f32.xlu1 %v1807_v56  ;;  %v1781_v57 = vpop.f32.mrf.mxu0 }
 0xbe5   :  { %v1796_v58 = vmul.f32 %v1781_v57, %v3526_v61  ;;  %v1794_v61 = vmul.f32 %v2626_v46, %v1790_v50 }
 0xbe7   :  { %v3581_v63 = vadd.f32 %v1796_v58, %v1792_v0 }
 0xbe9   :  { %v1804_v2 = vmul.f32 %v3581_v63, %v3581_v63 }
 0xbeb   :  { %v1810_v3 = vsel %vm202_vm3, %v1804_v2, 0.0 }
 0xbec   :  { %1811 = vadd.xlane.f32.xlu0 %v1810_v3  ;;  %v1784_v4 = vpop.f32.mrf.mxu0  ;;  %v1857_v3 = vand.u32 2147483648, %v3598_v15 }
 0xbed   :  { %v1797_v5 = vmul.f32 %v1784_v4, %v3524_v32  ;;  %v1825_v32 = vpop.xlane.xlu2 %1824 }
 0xbee   :  { %2605 = vrsqrt.f32 %v1825_v32  ;;  %vm1842_vm1 = vcmp.eq.f32.partialorder %v1825_v32, inf  ;;  %vm1844_vm2 = vcmp.eq.f32.partialorder %v1825_v32, 0.0  ;;  %v1845_v42 = vand.u32 2147483648, %v1825_v32 }
 0xbef   :  { %v3587_v6 = vadd.f32 %v1797_v5, %v1793_v36  ;;  %2607 = vrsqrt.f32 %v3598_v15 }
 0xbf0   :  { %2609 = vrsqrt.f32 %v3601_v21 }
 0xbf1   :  { %v1805_v7 = vmul.f32 %v3587_v6, %v3587_v6 }
 0xbf3   :  { %v1813_v34 = vsel %vm202_vm3, %v1805_v7, 0.0 }
 0xbf4   :  { %1814 = vadd.xlane.f32.xlu2 %v1813_v34  ;;  %v1786_v8 = vpop.f32.mrf.mxu0  ;;  %v2606_v10 = vpop.eup %2605 }
 0xbf5   :  { %v1798_v9 = vmul.f32 %v1786_v8, %v3528_v62  ;;  %v1836_v16 = vmul.f32 %v2606_v10, %v1825_v32  ;;  %v2608_v17 = vpop.eup %2607  ;;  %v3605_v29 = vpop.xlane.xlu2 %1833 }
 0xbf6   :  { %v1848_v62 = vmul.f32 %v2608_v17, %v3598_v15  ;;  %v2610_v27 = vpop.eup %2609 }
 0xbf7   :  { %v3593_v12 = vadd.f32 %v1798_v9, %v1794_v61  ;;  %v1837_v20 = vmul.f32 %v2606_v10, %v1836_v16  ;;  %v1860_v1 = vmul.f32 %v2610_v27, %v3601_v21 }
 0xbf8   :  { %v1849_v25 = vmul.f32 %v2608_v17, %v1848_v62 }
 0xbf9   :  { %v1806_v13 = vmul.f32 %v3593_v12, %v3593_v12  ;;  %v1838_v24 = vmul.f32 0.5, %v1837_v20  ;;  %v1861_v18 = vmul.f32 %v2610_v27, %v1860_v1 }
 0xbfa   :  { %v1850_v38 = vmul.f32 0.5, %v1849_v25 }
 0xbfb   :  { %v1816_v14 = vsel %vm202_vm3, %v1806_v13, 0.0  ;;  %v1839_v26 = vsub.f32 1.5, %v1838_v24  ;;  %v1862_v44 = vmul.f32 0.5, %v1861_v18 }
 0xbfc   :  { %1817 = vadd.xlane.f32.xlu1 %v1816_v14  ;;  %v1851_v59 = vsub.f32 1.5, %v1850_v38 }
 0xbfd   :  { %v1840_v31 = vmul.f32 %v2606_v10, %v1839_v26  ;;  %v1863_v55 = vsub.f32 1.5, %v1862_v44 }
 0xbfe   :  { %v1852_v41 = vmul.f32 %v2608_v17, %v1851_v59 }
 0xbff   :  { %v1841_v37 = vmul.f32 %v1840_v31, %v1825_v32  ;;  %v1864_v7 = vmul.f32 %v2610_v27, %v1863_v55 }
 0xc00   :  { %v1853_v50 = vmul.f32 %v1852_v41, %v3598_v15 }
 0xc01   :  { %v1843_v45 = vsel %vm1842_vm1, %v1825_v32, %v1841_v37  ;;  %v1865_v32 = vmul.f32 %v1864_v7, %v3601_v21  ;;  %vm1878_vm1 = vcmp.eq.f32.partialorder %v3605_v29, inf }
 0xc02   :  { %v1846_v51 = vsel %vm1844_vm2, %v1845_v42, %v1843_v45  ;;  %v1855_v2 = vsel %vm1854_vm14, %v3598_v15, %v1853_v50  ;;  %v1869_v15 = vand.u32 2147483648, %v3601_v21 }
 0xc57   :  { %v1809_v23 = vpop.xlane.xlu1 %1808 }
 0xc58   :  { %v1883_v11 = vmax.f32 %v1809_v23, 1e-16 }
 0xc5a   :  { %2611 = vrsqrt.f32 %v1883_v11  ;;  %vm1893_vm12 = vweird.f32 %v1883_v11 }
 0xc5b   :  { %2613 = vrsqrt.f32 %v3605_v29 }
 0xc5f   :  { %v1812_v30 = vpop.xlane.xlu0 %1811 }
 0xc60   :  { %v2612_v28 = vpop.eup %2611  ;;  %v1884_v60 = vmax.f32 %v1812_v30, 1e-16 }
 0xc61   :  { %v1888_v33 = vmul.f32 %v2612_v28, %v1883_v11  ;;  %v2614_v39 = vpop.eup %2613  ;;  %vm1894_vm11 = vweird.f32 %v2612_v28  ;;  %v1867_v11 = vsel %vm1866_vm6, %v3601_v21, %v1865_v32 }
 0xc62   :  { %2615 = vrsqrt.f32 %v1884_v60  ;;  %v1872_v46 = vmul.f32 %v2614_v39, %v3605_v29  ;;  %vm1895_vm13 = vmor %vm1893_vm12, %vm1894_vm11  ;;  %vm1903_vm4 = vweird.f32 %v1884_v60  ;;  %v1870_v27 = vsel %vm1868_vm8, %v1869_v15, %v1867_v11 }
 0xc63   :  { %v1889_v35 = vmul.f32 %v2612_v28, %v1888_v33  ;;  %vm1880_vm11 = vcmp.eq.f32.partialorder %v3605_v29, 0.0 }
 0xc64   :  { %v1873_v0 = vmul.f32 %v2614_v39, %v1872_v46 }
 0xc65   :  { %v1890_v19 = vmul.f32 0.5, %v1889_v35 }
 0xc66   :  { %v1874_v34 = vmul.f32 0.5, %v1873_v0 }
 0xc67   :  { %v1891_v22 = vsub.f32 1.5, %v1890_v19  ;;  %v1815_v43 = vpop.xlane.xlu2 %1814 }
 0xc68   :  { %v2616_v40 = vpop.eup %2615  ;;  %v1885_v47 = vmax.f32 %v1815_v43, 1e-16  ;;  %v1875_v10 = vsub.f32 1.5, %v1874_v34 }
 0xc69   :  { %v1892_v48 = vmul.f32 %v2612_v28, %v1891_v22  ;;  %v1898_v49 = vmul.f32 %v2616_v40, %v1884_v60  ;;  %vm1904_vm15 = vweird.f32 %v2616_v40  ;;  %v1881_v60 = vand.u32 2147483648, %v3605_v29 }
 0xc6a   :  { %2617 = vrsqrt.f32 %v1885_v47  ;;  %vm1905_vm5 = vmor %vm1903_vm4, %vm1904_vm15  ;;  %v1876_v24 = vmul.f32 %v2614_v39, %v1875_v10  ;;  %vm1913_vm9 = vweird.f32 %v1885_v47 }
 0xc6b   :  { %v1896_v52 = vsel %vm1895_vm13, %v2612_v28, %v1892_v48  ;;  %v1899_v53 = vmul.f32 %v2616_v40, %v1898_v49 }
 0xc6c   :  { %v1927_v56 = vmul.f32 %v1896_v52, %v1846_v51 }
 0xc6d   :  { %v1900_v57 = vmul.f32 0.5, %v1899_v53 }
 0xc6e   :  { %v1931_v58 = vmul.f32 %v1927_v56, %v3575_v54  ;;  %v1858_v54 = vsel %vm1856_vm0, %v1857_v3, %v1855_v2 }
 0xc6f   :  { %v1901_v36 = vsub.f32 1.5, %v1900_v57  ;;  %v1818_v4 = vpop.xlane.xlu1 %1817 }
 0xc70   :  { %v2618_v5 = vpop.eup %2617  ;;  %1935 = vst.msk [vmem:[#allocation5] sm:$0xff] %vm202_vm3, %v1931_v58  ;;  %v1886_v61 = vmax.f32 %v1818_v4, 1e-16 }
 0xc71   :  { %v1902_v8 = vmul.f32 %v2616_v40, %v1901_v36  ;;  %v1908_v9 = vmul.f32 %v2618_v5, %v1885_v47  ;;  %vm1914_vm7 = vweird.f32 %v2618_v5 }
 0xc72   :  { %2619 = vrsqrt.f32 %v1886_v61  ;;  %vm1915_vm10 = vmor %vm1913_vm9, %vm1914_vm7  ;;  %vm1923_vm12 = vweird.f32 %v1886_v61 }
 0xc73   :  { %v1906_v13 = vsel %vm1905_vm5, %v2616_v40, %v1902_v8  ;;  %v1909_v14 = vmul.f32 %v2618_v5, %v1908_v9 }
 0xc74   :  { %v1928_v16 = vmul.f32 %v1906_v13, %v1858_v54 }
 0xc75   :  { %v1910_v17 = vmul.f32 0.5, %v1909_v14 }
 0xc76   :  { %v1932_v20 = vmul.f32 %v1928_v16, %v3581_v63  ;;  %v1877_v63 = vmul.f32 %v1876_v24, %v3605_v29 }
 0xc77   :  { %v1911_v62 = vsub.f32 1.5, %v1910_v17 }
 0xc78   :  { %v2620_v23 = vpop.eup %2619  ;;  %1936 = vst.msk [vmem:[#allocation5 + $0x8] sm:$0xff] %vm202_vm3, %v1932_v20  ;;  %v1879_v21 = vsel %vm1878_vm1, %v3605_v29, %v1877_v63 }
 0xc79   :  { %v1912_v25 = vmul.f32 %v2618_v5, %v1911_v62  ;;  %v1918_v26 = vmul.f32 %v2620_v23, %v1886_v61  ;;  %vm1924_vm2 = vweird.f32 %v2620_v23 }
 0xc7a   :  { %vm1925_vm13 = vmor %vm1923_vm12, %vm1924_vm2 }
 0xc7b   :  { %v1916_v38 = vsel %vm1915_vm10, %v2618_v5, %v1912_v25  ;;  %v1919_v30 = vmul.f32 %v2620_v23, %v1918_v26 }
 0xc7c   :  { %v1929_v28 = vmul.f32 %v1916_v38, %v1870_v27 }
 0xc7d   :  { %v1920_v31 = vmul.f32 0.5, %v1919_v30 }
 0xc7e   :  { %v1933_v1 = vmul.f32 %v1929_v28, %v3587_v6  ;;  %v1882_v6 = vsel %vm1880_vm11, %v1881_v60, %v1879_v21 }
 0xc7f   :  { %v1921_v33 = vsub.f32 1.5, %v1920_v31 }
 0xc80   :  { %1937 = vst.msk [vmem:[#allocation5 + $0x10] sm:$0xff] %vm202_vm3, %v1933_v1 }
 0xc81   :  { %v1922_v59 = vmul.f32 %v2620_v23, %v1921_v33 }
 0xc83   :  { %v1926_v35 = vsel %vm1925_vm13, %v2620_v23, %v1922_v59 }
 0xc84   :  { %v1930_v37 = vmul.f32 %v1926_v35, %v1882_v6 }
 0xc86   :  { %v1934_v18 = vmul.f32 %v1930_v37, %v3593_v12 }
 0xc88   :  { %1938 = vst.msk [vmem:[#allocation5 + $0x18] sm:$0xff] %vm202_vm3, %v1934_v18 }
 0xc89   :  { %1951 = dma.vmem_to_hbm [thread:$0]  %s1944_s11, 512, %s1946_s27, [#allocation3], %s2672_s14, %s2672_s14, %s2673_s15  }
 0xc8a   :  { %2665 = dma.done.wait [#allocation3], 512  }
 0xc8b   :  { %2666 = vsyncadd [#allocation3], 4294966784 }
 0xc8c   :  { %1956 = vsyncpa [#allocation3], 1 }
 0xc8d   :  { %1957 = vsyncpa [#allocation4], 1 }

</bundles_post_ra>
